<compile_context>
chip_gen: v6e
topology: v6e:2x2x1
jax: 0.10.0
libtpu: 0.0.40
codegen_flags: <defaults>
</compile_context>

<pallas_src>
import jax
import jax.numpy as jnp
from jax.experimental import pallas as pl
from jax.experimental.pallas import tpu as pltpu


TM_CAP = 512  # output rows per tile; 2x(4*tm*Kp*2B) patch bufs stay well < 16 MiB


def _round_up(x, m):
    return ((x + m - 1) // m) * m


def _pick_tile(m):
    """Rows per grid step: multiple of 16 (bf16-friendly sublanes), <= TM_CAP,
    and >= 2 tiles whenever M allows so dimension_semantics=("parallel",) can
    shard the grid across v7x's two TensorCores."""
    tm = _round_up(m, 16)
    if m >= 32:
        tm = min(tm, _round_up((m + 1) // 2, 16))
    return min(tm, TM_CAP)


# ----------------------------------------------------------------------------
# Kernels
# ----------------------------------------------------------------------------
def conv_block_kernel(p_ref, w_ref, b_ref, o_ref):
    """Fused conv(3x3) + bias/BN + ReLU + MaxPool(2x2) for one M-tile.

    p_ref: (4, tm, Kp) bf16  im2col rows, one leading slab per pool position
    w_ref: (Kp, Cp)    bf16  conv weights, BN scale folded in, zero-padded
    b_ref: (1, Cp)     f32   conv bias * BN scale + BN shift (zero in padding)
    o_ref: (tm, Cp)    bf16  max over the 4 pool positions
    """
    w = w_ref[...]
    b = b_ref[...]

    def branch(i):
        return jnp.maximum(
            jnp.dot(p_ref[i], w, preferred_element_type=jnp.float32) + b, 0.0)

    y = jnp.maximum(jnp.maximum(branch(0), branch(1)),
                    jnp.maximum(branch(2), branch(3)))
    o_ref[...] = y.astype(o_ref.dtype)


def conv_block_linear_kernel(p_ref, w_ref, b_ref, wl_ref, bl_ref, o_ref):
    """Last conv block with the final Linear fused into the epilogue.

    Valid only when the pooled output is 1x1 spatially (outSize == hidden_dim).
    wl_ref: (Cp, NCp) bf16 zero-padded linear weight (lw.T), bl_ref: (1, NCp) f32.
    o_ref:  (tm, NCp) f32 class scores (padded rows/cols sliced off by caller).
    """
    w = w_ref[...]
    b = b_ref[...]

    def branch(i):
        return jnp.maximum(
            jnp.dot(p_ref[i], w, preferred_element_type=jnp.float32) + b, 0.0)

    y = jnp.maximum(jnp.maximum(branch(0), branch(1)),
                    jnp.maximum(branch(2), branch(3)))
    # Padded channels of y are exactly zero (zero bias + ReLU) and padded rows of
    # wl are zero, so the full padded dot is exact.
    o_ref[...] = (jnp.dot(y.astype(wl_ref.dtype), wl_ref[...],
                          preferred_element_type=jnp.float32) + bl_ref[...])


def linear_kernel(x_ref, w_ref, b_ref, o_ref):
    """Standalone Linear (generic fallback when finalSize > 1)."""
    o_ref[...] = (jnp.dot(x_ref[...], w_ref[...],
                          preferred_element_type=jnp.float32) + b_ref[...])


# ----------------------------------------------------------------------------
# Host-side glue
# ----------------------------------------------------------------------------
def _im2col_pool(x, k_pad, m_pad):
    """x: (N, H, W, C) NHWC -> patches (4, m_pad, k_pad) bf16.

    Leading axis = the 4 MaxPool positions; rows = (n, ho, wo) pooled-output
    positions. No per-tile transpose/reshape relayout; bf16 from the start.
    """
    x = x.astype(jnp.bfloat16)
    N, H, W, C = x.shape
    Ho, Wo = H // 2, W // 2
    M = N * Ho * Wo
    K = 9 * C
    xp = jnp.pad(x, ((0, 0), (1, 1), (1, 1), (0, 0)))
    groups = []
    for ph in range(2):
        for pw in range(2):
            cols = [xp[:, ph + dy: ph + dy + 2 * Ho: 2,
                       pw + dx: pw + dx + 2 * Wo: 2, :]          # (N, Ho, Wo, C)
                    for dy in range(3) for dx in range(3)]
            groups.append(jnp.concatenate(cols, axis=-1).reshape(M, K))
    p = jnp.stack(groups, axis=0)                                 # (4, M, K)
    p = jnp.pad(p, ((0, 0), (0, m_pad - M), (0, k_pad - K)))      # M/K padding
    return p                                                      # bf16


def conv_block_apply(x, block_params, fuse_linear=None):
    """x: (N, H, W, Cin) NHWC -> (N, H//2, W//2, Cout) bf16, or (N, classes) f32."""
    w2p, bias, cout = block_params
    N, H, W, _ = x.shape
    Ho, Wo = H // 2, W // 2
    M = N * Ho * Wo
    Kp, Cp = w2p.shape

    tm = _pick_tile(M)
    m_pad = _round_up(M, tm)
    nmt = m_pad // tm
    patches = _im2col_pool(x, Kp, m_pad)      # (4, m_pad, Kp) bf16

    common = dict(
        compiler_params=pltpu.CompilerParams(
            dimension_semantics=("parallel",)),   # M tiles shard across TCs on v7x
    )
    patch_spec = pl.BlockSpec((4, tm, Kp), lambda i: (0, i, 0))
    w_spec = pl.BlockSpec((Kp, Cp), lambda i: (0, 0))
    b_spec = pl.BlockSpec((1, Cp), lambda i: (0, 0))

    if fuse_linear is None:
        out = pl.pallas_call(
            conv_block_kernel,
            out_shape=jax.ShapeDtypeStruct((m_pad, Cp), jnp.bfloat16),
            grid_spec=pltpu.PrefetchScalarGridSpec(
                num_scalar_prefetch=0,
                grid=(nmt,),
                in_specs=[patch_spec, w_spec, b_spec],
                out_specs=pl.BlockSpec((tm, Cp), lambda i: (i, 0)),
            ),
            **common,
        )(patches, w2p, bias)
        return out[:M, :cout].reshape(N, Ho, Wo, cout)

    wl, bl, num_classes = fuse_linear
    ncp = wl.shape[1]
    out = pl.pallas_call(
        conv_block_linear_kernel,
        out_shape=jax.ShapeDtypeStruct((m_pad, ncp), jnp.float32),
        grid_spec=pltpu.PrefetchScalarGridSpec(
            num_scalar_prefetch=0,
            grid=(nmt,),
            in_specs=[patch_spec, w_spec, b_spec,
                      pl.BlockSpec((Cp, ncp), lambda i: (0, 0)),
                      pl.BlockSpec((1, ncp), lambda i: (0, 0))],
            out_specs=pl.BlockSpec((tm, ncp), lambda i: (i, 0)),
        ),
        **common,
    )(patches, w2p, bias, wl, bl)
    # Pooled output is 1x1 so M == N and NHWC row order == batch order.
    return out[:N, :num_classes]


def init_conv_block_params(key, cin, cout, eps=1e-5):
    k1, k2, k3, k4 = jax.random.split(key, 4)
    w = jax.random.normal(k1, (cout, cin, 3, 3), jnp.float32) * 0.1   # PyTorch OIHW
    b = jax.random.normal(k2, (cout,), jnp.float32) * 0.1
    gamma = 1.0 + 0.1 * jax.random.normal(k3, (cout,), jnp.float32)
    beta = 0.1 * jax.random.normal(k4, (cout,), jnp.float32)
    running_mean = jnp.zeros((cout,), jnp.float32)
    running_var = jnp.ones((cout,), jnp.float32)
    # Fold eval-mode BN + conv bias into per-channel scale/shift.
    scale = gamma / jnp.sqrt(running_var + eps)
    shift = beta - running_mean * scale
    # im2col layout: row index = (dy*3 + dx)*cin + ci  (matches _im2col_pool cols)
    w2 = jnp.transpose(w, (2, 3, 1, 0)).reshape(9 * cin, cout)
    w2 = w2 * scale[None, :]                       # fold BN scale into weights
    bias_total = b * scale + shift
    # K padded only to a sublane-friendly multiple of 16 (block dims equal full
    # array dims so this is legal; the kernels are DMA-bound, smaller K = fewer
    # patch bytes). Cout padded to 128 lanes for unmasked, lane-dense stores.
    k_pad = _round_up(9 * cin, 16)
    c_pad = _round_up(cout, 128)
    w2p = jnp.zeros((k_pad, c_pad), jnp.float32).at[:9 * cin, :cout].set(w2)
    bp = jnp.zeros((1, c_pad), jnp.float32).at[:, :cout].set(bias_total)
    return w2p.astype(jnp.bfloat16), bp, cout


def conv4_forward(x_nchw, params):
    x = jnp.transpose(x_nchw, (0, 2, 3, 1))        # NCHW -> NHWC (bf16 cast in glue)
    blocks = params["blocks"]
    nb = len(blocks)
    for bi, blk in enumerate(blocks):
        is_last = bi == nb - 1
        if (is_last and params["linear_fused"] is not None
                and x.shape[1] // 2 == 1 and x.shape[2] // 2 == 1):
            # Fuse the final Linear into the last block's epilogue (outSize == hidden).
            return conv_block_apply(x, blk, fuse_linear=params["linear_fused"])
        x = conv_block_apply(x, blk)

    # Generic fallback (finalSize > 1): PyTorch x.view flattens in NCHW order.
    wl_flat, bl_flat, out_size, num_classes = params["linear_flat"]
    N = x.shape[0]
    xf = jnp.transpose(x, (0, 3, 1, 2)).reshape(N, out_size).astype(jnp.bfloat16)
    k_lin, ncp = wl_flat.shape
    xf = jnp.pad(xf, ((0, 0), (0, k_lin - out_size)))
    out = pl.pallas_call(
        linear_kernel,
        out_shape=jax.ShapeDtypeStruct((N, ncp), jnp.float32),
        in_specs=[pl.BlockSpec(memory_space=pltpu.MemorySpace.VMEM),
                  pl.BlockSpec(memory_space=pltpu.MemorySpace.VMEM),
                  pl.BlockSpec(memory_space=pltpu.MemorySpace.VMEM)],
        out_specs=pl.BlockSpec(memory_space=pltpu.MemorySpace.VMEM),
    )(xf, wl_flat, bl_flat)
    return out[:, :num_classes]


if __name__ == "__main__":
    image_size, num_channels, num_classes, hidden_dim = 16, 4, 10, 32
    batch = 2

    root = jax.random.PRNGKey(0)
    keys = jax.random.split(root, 7)

    blocks = []
    cin = num_channels
    for i in range(4):
        blocks.append(init_conv_block_params(keys[i], cin, hidden_dim))
        cin = hidden_dim

    final_size = image_size // 16
    out_size = final_size * final_size * hidden_dim   # = self.outSize
    lw = jax.random.normal(keys[4], (num_classes, out_size), jnp.float32) * 0.1
    lb = jax.random.normal(keys[5], (num_classes,), jnp.float32) * 0.1

    nc_pad = _round_up(num_classes, 128)
    if final_size == 1:
        c_pad = _round_up(hidden_dim, 128)
        wl_fused = (jnp.zeros((c_pad, nc_pad), jnp.float32)
                    .at[:hidden_dim, :num_classes].set(lw.T)).astype(jnp.bfloat16)
        bl_fused = jnp.zeros((1, nc_pad), jnp.float32).at[:, :num_classes].set(lb)
        linear_fused = (wl_fused, bl_fused, num_classes)
    else:
        linear_fused = None
    k_lin = _round_up(out_size, 128)
    wl_flat = (jnp.zeros((k_lin, nc_pad), jnp.float32)
               .at[:out_size, :num_classes].set(lw.T)).astype(jnp.bfloat16)
    bl_flat = jnp.zeros((1, nc_pad), jnp.float32).at[:, :num_classes].set(lb)

    params = {"blocks": blocks,
              "linear_fused": linear_fused,
              "linear_flat": (wl_flat, bl_flat, out_size, num_classes)}

    x = jax.random.normal(keys[6], (batch, num_channels, image_size, image_size),
                          jnp.float32)

    fwd = jax.jit(lambda xx: conv4_forward(xx, params))
    out = fwd(x)
    jax.block_until_ready(out)
    assert out.shape == (batch, num_classes) and out.dtype == jnp.float32
    print("KERNEL_OK")
</pallas_src>

<mosaic_0001>
module attributes {stable_mosaic.version = 11 : i64} {
  func.func @conv_block_kernel(%arg0: i32, %arg1: memref<4x64x48xbf16, #tpu.memory_space<vmem>>, %arg2: memref<48x128xbf16, #tpu.memory_space<vmem>>, %arg3: memref<1x128xf32, #tpu.memory_space<vmem>>, %arg4: memref<64x128xbf16, #tpu.memory_space<vmem>>) attributes {dimension_semantics = [#tpu.dimension_semantics<parallel>], iteration_bounds = array<i64: 2>, scalar_prefetch = 0 : i64, scratch_operands = 0 : i64, tpu.core_type = #tpu.core_type<tc>, window_params = [{transform_indices = @transform_0, window_bounds = array<i64: 4, 64, 48>}, {pipeline_mode = #tpu.pipeline_mode<synchronous>, transform_indices = @transform_1, window_bounds = array<i64: 48, 128>}, {pipeline_mode = #tpu.pipeline_mode<synchronous>, transform_indices = @transform_2, window_bounds = array<i64: 1, 128>}, {transform_indices = @transform_3, window_bounds = array<i64: 64, 128>}]} {
    %c0 = arith.constant 0 : index
    %c0_0 = arith.constant 0 : index
    %0 = vector.load %arg2[%c0, %c0_0] : memref<48x128xbf16, #tpu.memory_space<vmem>>, vector<48x128xbf16>
    %c0_1 = arith.constant 0 : index
    %c0_2 = arith.constant 0 : index
    %1 = vector.load %arg3[%c0_1, %c0_2] : memref<1x128xf32, #tpu.memory_space<vmem>>, vector<1x128xf32>
    %c0_3 = arith.constant 0 : index
    %c0_4 = arith.constant 0 : index
    %c0_5 = arith.constant 0 : index
    %2 = vector.load %arg1[%c0_3, %c0_4, %c0_5] : memref<4x64x48xbf16, #tpu.memory_space<vmem>>, vector<1x64x48xbf16>
    %3 = vector.shape_cast %2 : vector<1x64x48xbf16> to vector<64x48xbf16>
    %cst = arith.constant dense<0.000000e+00> : vector<64x128xf32>
    %4 = tpu.matmul %3, %0, %cst {dimension_numbers = #tpu.dot_dimension_numbers<[1], [0], [0], [1], [0, 0, 1, 1], [], []>} : vector<64x48xbf16>, vector<48x128xbf16>, vector<64x128xf32> -> vector<64x128xf32>
    %5 = vector.broadcast %1 : vector<1x128xf32> to vector<64x128xf32>
    %6 = arith.addf %4, %5 : vector<64x128xf32>
    %cst_6 = arith.constant 0.000000e+00 : f32
    %7 = vector.broadcast %cst_6 : f32 to vector<64x128xf32>
    %8 = arith.maximumf %6, %7 : vector<64x128xf32>
    %c1 = arith.constant 1 : index
    %c0_7 = arith.constant 0 : index
    %c0_8 = arith.constant 0 : index
    %9 = vector.load %arg1[%c1, %c0_7, %c0_8] : memref<4x64x48xbf16, #tpu.memory_space<vmem>>, vector<1x64x48xbf16>
    %10 = vector.shape_cast %9 : vector<1x64x48xbf16> to vector<64x48xbf16>
    %cst_9 = arith.constant dense<0.000000e+00> : vector<64x128xf32>
    %11 = tpu.matmul %10, %0, %cst_9 {dimension_numbers = #tpu.dot_dimension_numbers<[1], [0], [0], [1], [0, 0, 1, 1], [], []>} : vector<64x48xbf16>, vector<48x128xbf16>, vector<64x128xf32> -> vector<64x128xf32>
    %12 = vector.broadcast %1 : vector<1x128xf32> to vector<64x128xf32>
    %13 = arith.addf %11, %12 : vector<64x128xf32>
    %cst_10 = arith.constant 0.000000e+00 : f32
    %14 = vector.broadcast %cst_10 : f32 to vector<64x128xf32>
    %15 = arith.maximumf %13, %14 : vector<64x128xf32>
    %16 = arith.maximumf %8, %15 : vector<64x128xf32>
    %c2 = arith.constant 2 : index
    %c0_11 = arith.constant 0 : index
    %c0_12 = arith.constant 0 : index
    %17 = vector.load %arg1[%c2, %c0_11, %c0_12] : memref<4x64x48xbf16, #tpu.memory_space<vmem>>, vector<1x64x48xbf16>
    %18 = vector.shape_cast %17 : vector<1x64x48xbf16> to vector<64x48xbf16>
    %cst_13 = arith.constant dense<0.000000e+00> : vector<64x128xf32>
    %19 = tpu.matmul %18, %0, %cst_13 {dimension_numbers = #tpu.dot_dimension_numbers<[1], [0], [0], [1], [0, 0, 1, 1], [], []>} : vector<64x48xbf16>, vector<48x128xbf16>, vector<64x128xf32> -> vector<64x128xf32>
    %20 = vector.broadcast %1 : vector<1x128xf32> to vector<64x128xf32>
    %21 = arith.addf %19, %20 : vector<64x128xf32>
    %cst_14 = arith.constant 0.000000e+00 : f32
    %22 = vector.broadcast %cst_14 : f32 to vector<64x128xf32>
    %23 = arith.maximumf %21, %22 : vector<64x128xf32>
    %c3 = arith.constant 3 : index
    %c0_15 = arith.constant 0 : index
    %c0_16 = arith.constant 0 : index
    %24 = vector.load %arg1[%c3, %c0_15, %c0_16] : memref<4x64x48xbf16, #tpu.memory_space<vmem>>, vector<1x64x48xbf16>
    %25 = vector.shape_cast %24 : vector<1x64x48xbf16> to vector<64x48xbf16>
    %cst_17 = arith.constant dense<0.000000e+00> : vector<64x128xf32>
    %26 = tpu.matmul %25, %0, %cst_17 {dimension_numbers = #tpu.dot_dimension_numbers<[1], [0], [0], [1], [0, 0, 1, 1], [], []>} : vector<64x48xbf16>, vector<48x128xbf16>, vector<64x128xf32> -> vector<64x128xf32>
    %27 = vector.broadcast %1 : vector<1x128xf32> to vector<64x128xf32>
    %28 = arith.addf %26, %27 : vector<64x128xf32>
    %cst_18 = arith.constant 0.000000e+00 : f32
    %29 = vector.broadcast %cst_18 : f32 to vector<64x128xf32>
    %30 = arith.maximumf %28, %29 : vector<64x128xf32>
    %31 = arith.maximumf %23, %30 : vector<64x128xf32>
    %32 = arith.maximumf %16, %31 : vector<64x128xf32>
    %33 = arith.truncf %32 : vector<64x128xf32> to vector<64x128xbf16>
    %c0_19 = arith.constant 0 : index
    %c0_20 = arith.constant 0 : index
    %34 = vector.load %arg4[%c0_19, %c0_20] : memref<64x128xbf16, #tpu.memory_space<vmem>>, vector<64x128xbf16>
    tpu.vector_store %arg4[%c0_19, %c0_20], %33 {strides = array<i32>} : memref<64x128xbf16, #tpu.memory_space<vmem>>, vector<64x128xbf16>,
    return
  }
  func.func @transform_0(%arg0: i32) -> (i32, i32, i32) {
    %c0_i32 = arith.constant 0 : i32
    %c0_i32_0 = arith.constant 0 : i32
    %c0_i32_1 = arith.constant 0 : i32
    return %c0_i32, %arg0, %c0_i32_0 : i32, i32, i32
  }
  func.func @transform_1(%arg0: i32) -> (i32, i32) {
    %c0_i32 = arith.constant 0 : i32
    %c0_i32_0 = arith.constant 0 : i32
    %c0_i32_1 = arith.constant 0 : i32
    return %c0_i32, %c0_i32_0 : i32, i32
  }
  func.func @transform_2(%arg0: i32) -> (i32, i32) {
    %c0_i32 = arith.constant 0 : i32
    %c0_i32_0 = arith.constant 0 : i32
    %c0_i32_1 = arith.constant 0 : i32
    return %c0_i32, %c0_i32_0 : i32, i32
  }
  func.func @transform_3(%arg0: i32) -> (i32, i32) {
    %c0_i32 = arith.constant 0 : i32
    %c0_i32_0 = arith.constant 0 : i32
    return %arg0, %c0_i32 : i32, i32
  }
}

module attributes {stable_mosaic.version = 11 : i64} {
  func.func @conv_block_kernel(%arg0: i32, %arg1: memref<4x16x288xbf16, #tpu.memory_space<vmem>>, %arg2: memref<288x128xbf16, #tpu.memory_space<vmem>>, %arg3: memref<1x128xf32, #tpu.memory_space<vmem>>, %arg4: memref<16x128xbf16, #tpu.memory_space<vmem>>) attributes {dimension_semantics = [#tpu.dimension_semantics<parallel>], iteration_bounds = array<i64: 2>, scalar_prefetch = 0 : i64, scratch_operands = 0 : i64, tpu.core_type = #tpu.core_type<tc>, window_params = [{transform_indices = @transform_0, window_bounds = array<i64: 4, 16, 288>}, {pipeline_mode = #tpu.pipeline_mode<synchronous>, transform_indices = @transform_1, window_bounds = array<i64: 288, 128>}, {pipeline_mode = #tpu.pipeline_mode<synchronous>, transform_indices = @transform_2, window_bounds = array<i64: 1, 128>}, {transform_indices = @transform_3, window_bounds = array<i64: 16, 128>}]} {
    %c0 = arith.constant 0 : index
    %c0_0 = arith.constant 0 : index
    %0 = vector.load %arg2[%c0, %c0_0] : memref<288x128xbf16, #tpu.memory_space<vmem>>, vector<288x128xbf16>
    %c0_1 = arith.constant 0 : index
    %c0_2 = arith.constant 0 : index
    %1 = vector.load %arg3[%c0_1, %c0_2] : memref<1x128xf32, #tpu.memory_space<vmem>>, vector<1x128xf32>
    %c0_3 = arith.constant 0 : index
    %c0_4 = arith.constant 0 : index
    %c0_5 = arith.constant 0 : index
    %2 = vector.load %arg1[%c0_3, %c0_4, %c0_5] : memref<4x16x288xbf16, #tpu.memory_space<vmem>>, vector<1x16x288xbf16>
    %3 = vector.shape_cast %2 : vector<1x16x288xbf16> to vector<16x288xbf16>
    %cst = arith.constant dense<0.000000e+00> : vector<16x128xf32>
    %4 = tpu.matmul %3, %0, %cst {dimension_numbers = #tpu.dot_dimension_numbers<[1], [0], [0], [1], [0, 0, 1, 1], [], []>} : vector<16x288xbf16>, vector<288x128xbf16>, vector<16x128xf32> -> vector<16x128xf32>
    %5 = vector.broadcast %1 : vector<1x128xf32> to vector<16x128xf32>
    %6 = arith.addf %4, %5 : vector<16x128xf32>
    %cst_6 = arith.constant 0.000000e+00 : f32
    %7 = vector.broadcast %cst_6 : f32 to vector<16x128xf32>
    %8 = arith.maximumf %6, %7 : vector<16x128xf32>
    %c1 = arith.constant 1 : index
    %c0_7 = arith.constant 0 : index
    %c0_8 = arith.constant 0 : index
    %9 = vector.load %arg1[%c1, %c0_7, %c0_8] : memref<4x16x288xbf16, #tpu.memory_space<vmem>>, vector<1x16x288xbf16>
    %10 = vector.shape_cast %9 : vector<1x16x288xbf16> to vector<16x288xbf16>
    %cst_9 = arith.constant dense<0.000000e+00> : vector<16x128xf32>
    %11 = tpu.matmul %10, %0, %cst_9 {dimension_numbers = #tpu.dot_dimension_numbers<[1], [0], [0], [1], [0, 0, 1, 1], [], []>} : vector<16x288xbf16>, vector<288x128xbf16>, vector<16x128xf32> -> vector<16x128xf32>
    %12 = vector.broadcast %1 : vector<1x128xf32> to vector<16x128xf32>
    %13 = arith.addf %11, %12 : vector<16x128xf32>
    %cst_10 = arith.constant 0.000000e+00 : f32
    %14 = vector.broadcast %cst_10 : f32 to vector<16x128xf32>
    %15 = arith.maximumf %13, %14 : vector<16x128xf32>
    %16 = arith.maximumf %8, %15 : vector<16x128xf32>
    %c2 = arith.constant 2 : index
    %c0_11 = arith.constant 0 : index
    %c0_12 = arith.constant 0 : index
    %17 = vector.load %arg1[%c2, %c0_11, %c0_12] : memref<4x16x288xbf16, #tpu.memory_space<vmem>>, vector<1x16x288xbf16>
    %18 = vector.shape_cast %17 : vector<1x16x288xbf16> to vector<16x288xbf16>
    %cst_13 = arith.constant dense<0.000000e+00> : vector<16x128xf32>
    %19 = tpu.matmul %18, %0, %cst_13 {dimension_numbers = #tpu.dot_dimension_numbers<[1], [0], [0], [1], [0, 0, 1, 1], [], []>} : vector<16x288xbf16>, vector<288x128xbf16>, vector<16x128xf32> -> vector<16x128xf32>
    %20 = vector.broadcast %1 : vector<1x128xf32> to vector<16x128xf32>
    %21 = arith.addf %19, %20 : vector<16x128xf32>
    %cst_14 = arith.constant 0.000000e+00 : f32
    %22 = vector.broadcast %cst_14 : f32 to vector<16x128xf32>
    %23 = arith.maximumf %21, %22 : vector<16x128xf32>
    %c3 = arith.constant 3 : index
    %c0_15 = arith.constant 0 : index
    %c0_16 = arith.constant 0 : index
    %24 = vector.load %arg1[%c3, %c0_15, %c0_16] : memref<4x16x288xbf16, #tpu.memory_space<vmem>>, vector<1x16x288xbf16>
    %25 = vector.shape_cast %24 : vector<1x16x288xbf16> to vector<16x288xbf16>
    %cst_17 = arith.constant dense<0.000000e+00> : vector<16x128xf32>
    %26 = tpu.matmul %25, %0, %cst_17 {dimension_numbers = #tpu.dot_dimension_numbers<[1], [0], [0], [1], [0, 0, 1, 1], [], []>} : vector<16x288xbf16>, vector<288x128xbf16>, vector<16x128xf32> -> vector<16x128xf32>
    %27 = vector.broadcast %1 : vector<1x128xf32> to vector<16x128xf32>
    %28 = arith.addf %26, %27 : vector<16x128xf32>
    %cst_18 = arith.constant 0.000000e+00 : f32
    %29 = vector.broadcast %cst_18 : f32 to vector<16x128xf32>
    %30 = arith.maximumf %28, %29 : vector<16x128xf32>
    %31 = arith.maximumf %23, %30 : vector<16x128xf32>
    %32 = arith.maximumf %16, %31 : vector<16x128xf32>
    %33 = arith.truncf %32 : vector<16x128xf32> to vector<16x128xbf16>
    %c0_19 = arith.constant 0 : index
    %c0_20 = arith.constant 0 : index
    %34 = vector.load %arg4[%c0_19, %c0_20] : memref<16x128xbf16, #tpu.memory_space<vmem>>, vector<16x128xbf16>
    tpu.vector_store %arg4[%c0_19, %c0_20], %33 {strides = array<i32>} : memref<16x128xbf16, #tpu.memory_space<vmem>>, vector<16x128xbf16>,
    return
  }
  func.func @transform_0(%arg0: i32) -> (i32, i32, i32) {
    %c0_i32 = arith.constant 0 : i32
    %c0_i32_0 = arith.constant 0 : i32
    %c0_i32_1 = arith.constant 0 : i32
    return %c0_i32, %arg0, %c0_i32_0 : i32, i32, i32
  }
  func.func @transform_1(%arg0: i32) -> (i32, i32) {
    %c0_i32 = arith.constant 0 : i32
    %c0_i32_0 = arith.constant 0 : i32
    %c0_i32_1 = arith.constant 0 : i32
    return %c0_i32, %c0_i32_0 : i32, i32
  }
  func.func @transform_2(%arg0: i32) -> (i32, i32) {
    %c0_i32 = arith.constant 0 : i32
    %c0_i32_0 = arith.constant 0 : i32
    %c0_i32_1 = arith.constant 0 : i32
    return %c0_i32, %c0_i32_0 : i32, i32
  }
  func.func @transform_3(%arg0: i32) -> (i32, i32) {
    %c0_i32 = arith.constant 0 : i32
    %c0_i32_0 = arith.constant 0 : i32
    return %arg0, %c0_i32 : i32, i32
  }
}

module attributes {stable_mosaic.version = 11 : i64} {
  func.func @conv_block_kernel(%arg0: i32, %arg1: memref<4x16x288xbf16, #tpu.memory_space<vmem>>, %arg2: memref<288x128xbf16, #tpu.memory_space<vmem>>, %arg3: memref<1x128xf32, #tpu.memory_space<vmem>>, %arg4: memref<16x128xbf16, #tpu.memory_space<vmem>>) attributes {dimension_semantics = [#tpu.dimension_semantics<parallel>], iteration_bounds = array<i64: 1>, scalar_prefetch = 0 : i64, scratch_operands = 0 : i64, tpu.core_type = #tpu.core_type<tc>, window_params = [{transform_indices = @transform_0, window_bounds = array<i64: 4, 16, 288>}, {pipeline_mode = #tpu.pipeline_mode<synchronous>, transform_indices = @transform_1, window_bounds = array<i64: 288, 128>}, {pipeline_mode = #tpu.pipeline_mode<synchronous>, transform_indices = @transform_2, window_bounds = array<i64: 1, 128>}, {transform_indices = @transform_3, window_bounds = array<i64: 16, 128>}]} {
    %c0 = arith.constant 0 : index
    %c0_0 = arith.constant 0 : index
    %0 = vector.load %arg2[%c0, %c0_0] : memref<288x128xbf16, #tpu.memory_space<vmem>>, vector<288x128xbf16>
    %c0_1 = arith.constant 0 : index
    %c0_2 = arith.constant 0 : index
    %1 = vector.load %arg3[%c0_1, %c0_2] : memref<1x128xf32, #tpu.memory_space<vmem>>, vector<1x128xf32>
    %c0_3 = arith.constant 0 : index
    %c0_4 = arith.constant 0 : index
    %c0_5 = arith.constant 0 : index
    %2 = vector.load %arg1[%c0_3, %c0_4, %c0_5] : memref<4x16x288xbf16, #tpu.memory_space<vmem>>, vector<1x16x288xbf16>
    %3 = vector.shape_cast %2 : vector<1x16x288xbf16> to vector<16x288xbf16>
    %cst = arith.constant dense<0.000000e+00> : vector<16x128xf32>
    %4 = tpu.matmul %3, %0, %cst {dimension_numbers = #tpu.dot_dimension_numbers<[1], [0], [0], [1], [0, 0, 1, 1], [], []>} : vector<16x288xbf16>, vector<288x128xbf16>, vector<16x128xf32> -> vector<16x128xf32>
    %5 = vector.broadcast %1 : vector<1x128xf32> to vector<16x128xf32>
    %6 = arith.addf %4, %5 : vector<16x128xf32>
    %cst_6 = arith.constant 0.000000e+00 : f32
    %7 = vector.broadcast %cst_6 : f32 to vector<16x128xf32>
    %8 = arith.maximumf %6, %7 : vector<16x128xf32>
    %c1 = arith.constant 1 : index
    %c0_7 = arith.constant 0 : index
    %c0_8 = arith.constant 0 : index
    %9 = vector.load %arg1[%c1, %c0_7, %c0_8] : memref<4x16x288xbf16, #tpu.memory_space<vmem>>, vector<1x16x288xbf16>
    %10 = vector.shape_cast %9 : vector<1x16x288xbf16> to vector<16x288xbf16>
    %cst_9 = arith.constant dense<0.000000e+00> : vector<16x128xf32>
    %11 = tpu.matmul %10, %0, %cst_9 {dimension_numbers = #tpu.dot_dimension_numbers<[1], [0], [0], [1], [0, 0, 1, 1], [], []>} : vector<16x288xbf16>, vector<288x128xbf16>, vector<16x128xf32> -> vector<16x128xf32>
    %12 = vector.broadcast %1 : vector<1x128xf32> to vector<16x128xf32>
    %13 = arith.addf %11, %12 : vector<16x128xf32>
    %cst_10 = arith.constant 0.000000e+00 : f32
    %14 = vector.broadcast %cst_10 : f32 to vector<16x128xf32>
    %15 = arith.maximumf %13, %14 : vector<16x128xf32>
    %16 = arith.maximumf %8, %15 : vector<16x128xf32>
    %c2 = arith.constant 2 : index
    %c0_11 = arith.constant 0 : index
    %c0_12 = arith.constant 0 : index
    %17 = vector.load %arg1[%c2, %c0_11, %c0_12] : memref<4x16x288xbf16, #tpu.memory_space<vmem>>, vector<1x16x288xbf16>
    %18 = vector.shape_cast %17 : vector<1x16x288xbf16> to vector<16x288xbf16>
    %cst_13 = arith.constant dense<0.000000e+00> : vector<16x128xf32>
    %19 = tpu.matmul %18, %0, %cst_13 {dimension_numbers = #tpu.dot_dimension_numbers<[1], [0], [0], [1], [0, 0, 1, 1], [], []>} : vector<16x288xbf16>, vector<288x128xbf16>, vector<16x128xf32> -> vector<16x128xf32>
    %20 = vector.broadcast %1 : vector<1x128xf32> to vector<16x128xf32>
    %21 = arith.addf %19, %20 : vector<16x128xf32>
    %cst_14 = arith.constant 0.000000e+00 : f32
    %22 = vector.broadcast %cst_14 : f32 to vector<16x128xf32>
    %23 = arith.maximumf %21, %22 : vector<16x128xf32>
    %c3 = arith.constant 3 : index
    %c0_15 = arith.constant 0 : index
    %c0_16 = arith.constant 0 : index
    %24 = vector.load %arg1[%c3, %c0_15, %c0_16] : memref<4x16x288xbf16, #tpu.memory_space<vmem>>, vector<1x16x288xbf16>
    %25 = vector.shape_cast %24 : vector<1x16x288xbf16> to vector<16x288xbf16>
    %cst_17 = arith.constant dense<0.000000e+00> : vector<16x128xf32>
    %26 = tpu.matmul %25, %0, %cst_17 {dimension_numbers = #tpu.dot_dimension_numbers<[1], [0], [0], [1], [0, 0, 1, 1], [], []>} : vector<16x288xbf16>, vector<288x128xbf16>, vector<16x128xf32> -> vector<16x128xf32>
    %27 = vector.broadcast %1 : vector<1x128xf32> to vector<16x128xf32>
    %28 = arith.addf %26, %27 : vector<16x128xf32>
    %cst_18 = arith.constant 0.000000e+00 : f32
    %29 = vector.broadcast %cst_18 : f32 to vector<16x128xf32>
    %30 = arith.maximumf %28, %29 : vector<16x128xf32>
    %31 = arith.maximumf %23, %30 : vector<16x128xf32>
    %32 = arith.maximumf %16, %31 : vector<16x128xf32>
    %33 = arith.truncf %32 : vector<16x128xf32> to vector<16x128xbf16>
    %c0_19 = arith.constant 0 : index
    %c0_20 = arith.constant 0 : index
    %34 = vector.load %arg4[%c0_19, %c0_20] : memref<16x128xbf16, #tpu.memory_space<vmem>>, vector<16x128xbf16>
    tpu.vector_store %arg4[%c0_19, %c0_20], %33 {strides = array<i32>} : memref<16x128xbf16, #tpu.memory_space<vmem>>, vector<16x128xbf16>,
    return
  }
  func.func @transform_0(%arg0: i32) -> (i32, i32, i32) {
    %c0_i32 = arith.constant 0 : i32
    %c0_i32_0 = arith.constant 0 : i32
    %c0_i32_1 = arith.constant 0 : i32
    return %c0_i32, %arg0, %c0_i32_0 : i32, i32, i32
  }
  func.func @transform_1(%arg0: i32) -> (i32, i32) {
    %c0_i32 = arith.constant 0 : i32
    %c0_i32_0 = arith.constant 0 : i32
    %c0_i32_1 = arith.constant 0 : i32
    return %c0_i32, %c0_i32_0 : i32, i32
  }
  func.func @transform_2(%arg0: i32) -> (i32, i32) {
    %c0_i32 = arith.constant 0 : i32
    %c0_i32_0 = arith.constant 0 : i32
    %c0_i32_1 = arith.constant 0 : i32
    return %c0_i32, %c0_i32_0 : i32, i32
  }
  func.func @transform_3(%arg0: i32) -> (i32, i32) {
    %c0_i32 = arith.constant 0 : i32
    %c0_i32_0 = arith.constant 0 : i32
    return %arg0, %c0_i32 : i32, i32
  }
}

module attributes {stable_mosaic.version = 11 : i64} {
  func.func @conv_block_linear_kernel(%arg0: i32, %arg1: memref<4x16x288xbf16, #tpu.memory_space<vmem>>, %arg2: memref<288x128xbf16, #tpu.memory_space<vmem>>, %arg3: memref<1x128xf32, #tpu.memory_space<vmem>>, %arg4: memref<128x128xbf16, #tpu.memory_space<vmem>>, %arg5: memref<1x128xf32, #tpu.memory_space<vmem>>, %arg6: memref<16x128xf32, #tpu.memory_space<vmem>>) attributes {dimension_semantics = [#tpu.dimension_semantics<parallel>], iteration_bounds = array<i64: 1>, scalar_prefetch = 0 : i64, scratch_operands = 0 : i64, tpu.core_type = #tpu.core_type<tc>, window_params = [{transform_indices = @transform_0, window_bounds = array<i64: 4, 16, 288>}, {pipeline_mode = #tpu.pipeline_mode<synchronous>, transform_indices = @transform_1, window_bounds = array<i64: 288, 128>}, {pipeline_mode = #tpu.pipeline_mode<synchronous>, transform_indices = @transform_2, window_bounds = array<i64: 1, 128>}, {pipeline_mode = #tpu.pipeline_mode<synchronous>, transform_indices = @transform_3, window_bounds = array<i64: 128, 128>}, {pipeline_mode = #tpu.pipeline_mode<synchronous>, transform_indices = @transform_4, window_bounds = array<i64: 1, 128>}, {transform_indices = @transform_5, window_bounds = array<i64: 16, 128>}]} {
    %c0 = arith.constant 0 : index
    %c0_0 = arith.constant 0 : index
    %0 = vector.load %arg2[%c0, %c0_0] : memref<288x128xbf16, #tpu.memory_space<vmem>>, vector<288x128xbf16>
    %c0_1 = arith.constant 0 : index
    %c0_2 = arith.constant 0 : index
    %1 = vector.load %arg3[%c0_1, %c0_2] : memref<1x128xf32, #tpu.memory_space<vmem>>, vector<1x128xf32>
    %c0_3 = arith.constant 0 : index
    %c0_4 = arith.constant 0 : index
    %c0_5 = arith.constant 0 : index
    %2 = vector.load %arg1[%c0_3, %c0_4, %c0_5] : memref<4x16x288xbf16, #tpu.memory_space<vmem>>, vector<1x16x288xbf16>
    %3 = vector.shape_cast %2 : vector<1x16x288xbf16> to vector<16x288xbf16>
    %cst = arith.constant dense<0.000000e+00> : vector<16x128xf32>
    %4 = tpu.matmul %3, %0, %cst {dimension_numbers = #tpu.dot_dimension_numbers<[1], [0], [0], [1], [0, 0, 1, 1], [], []>} : vector<16x288xbf16>, vector<288x128xbf16>, vector<16x128xf32> -> vector<16x128xf32>
    %5 = vector.broadcast %1 : vector<1x128xf32> to vector<16x128xf32>
    %6 = arith.addf %4, %5 : vector<16x128xf32>
    %cst_6 = arith.constant 0.000000e+00 : f32
    %7 = vector.broadcast %cst_6 : f32 to vector<16x128xf32>
    %8 = arith.maximumf %6, %7 : vector<16x128xf32>
    %c1 = arith.constant 1 : index
    %c0_7 = arith.constant 0 : index
    %c0_8 = arith.constant 0 : index
    %9 = vector.load %arg1[%c1, %c0_7, %c0_8] : memref<4x16x288xbf16, #tpu.memory_space<vmem>>, vector<1x16x288xbf16>
    %10 = vector.shape_cast %9 : vector<1x16x288xbf16> to vector<16x288xbf16>
    %cst_9 = arith.constant dense<0.000000e+00> : vector<16x128xf32>
    %11 = tpu.matmul %10, %0, %cst_9 {dimension_numbers = #tpu.dot_dimension_numbers<[1], [0], [0], [1], [0, 0, 1, 1], [], []>} : vector<16x288xbf16>, vector<288x128xbf16>, vector<16x128xf32> -> vector<16x128xf32>
    %12 = vector.broadcast %1 : vector<1x128xf32> to vector<16x128xf32>
    %13 = arith.addf %11, %12 : vector<16x128xf32>
    %cst_10 = arith.constant 0.000000e+00 : f32
    %14 = vector.broadcast %cst_10 : f32 to vector<16x128xf32>
    %15 = arith.maximumf %13, %14 : vector<16x128xf32>
    %16 = arith.maximumf %8, %15 : vector<16x128xf32>
    %c2 = arith.constant 2 : index
    %c0_11 = arith.constant 0 : index
    %c0_12 = arith.constant 0 : index
    %17 = vector.load %arg1[%c2, %c0_11, %c0_12] : memref<4x16x288xbf16, #tpu.memory_space<vmem>>, vector<1x16x288xbf16>
    %18 = vector.shape_cast %17 : vector<1x16x288xbf16> to vector<16x288xbf16>
    %cst_13 = arith.constant dense<0.000000e+00> : vector<16x128xf32>
    %19 = tpu.matmul %18, %0, %cst_13 {dimension_numbers = #tpu.dot_dimension_numbers<[1], [0], [0], [1], [0, 0, 1, 1], [], []>} : vector<16x288xbf16>, vector<288x128xbf16>, vector<16x128xf32> -> vector<16x128xf32>
    %20 = vector.broadcast %1 : vector<1x128xf32> to vector<16x128xf32>
    %21 = arith.addf %19, %20 : vector<16x128xf32>
    %cst_14 = arith.constant 0.000000e+00 : f32
    %22 = vector.broadcast %cst_14 : f32 to vector<16x128xf32>
    %23 = arith.maximumf %21, %22 : vector<16x128xf32>
    %c3 = arith.constant 3 : index
    %c0_15 = arith.constant 0 : index
    %c0_16 = arith.constant 0 : index
    %24 = vector.load %arg1[%c3, %c0_15, %c0_16] : memref<4x16x288xbf16, #tpu.memory_space<vmem>>, vector<1x16x288xbf16>
    %25 = vector.shape_cast %24 : vector<1x16x288xbf16> to vector<16x288xbf16>
    %cst_17 = arith.constant dense<0.000000e+00> : vector<16x128xf32>
    %26 = tpu.matmul %25, %0, %cst_17 {dimension_numbers = #tpu.dot_dimension_numbers<[1], [0], [0], [1], [0, 0, 1, 1], [], []>} : vector<16x288xbf16>, vector<288x128xbf16>, vector<16x128xf32> -> vector<16x128xf32>
    %27 = vector.broadcast %1 : vector<1x128xf32> to vector<16x128xf32>
    %28 = arith.addf %26, %27 : vector<16x128xf32>
    %cst_18 = arith.constant 0.000000e+00 : f32
    %29 = vector.broadcast %cst_18 : f32 to vector<16x128xf32>
    %30 = arith.maximumf %28, %29 : vector<16x128xf32>
    %31 = arith.maximumf %23, %30 : vector<16x128xf32>
    %32 = arith.maximumf %16, %31 : vector<16x128xf32>
    %33 = arith.truncf %32 : vector<16x128xf32> to vector<16x128xbf16>
    %c0_19 = arith.constant 0 : index
    %c0_20 = arith.constant 0 : index
    %34 = vector.load %arg4[%c0_19, %c0_20] : memref<128x128xbf16, #tpu.memory_space<vmem>>, vector<128x128xbf16>
    %cst_21 = arith.constant dense<0.000000e+00> : vector<16x128xf32>
    %35 = tpu.matmul %33, %34, %cst_21 {dimension_numbers = #tpu.dot_dimension_numbers<[1], [0], [0], [1], [0, 0, 1, 1], [], []>} : vector<16x128xbf16>, vector<128x128xbf16>, vector<16x128xf32> -> vector<16x128xf32>
    %c0_22 = arith.constant 0 : index
    %c0_23 = arith.constant 0 : index
    %36 = vector.load %arg5[%c0_22, %c0_23] : memref<1x128xf32, #tpu.memory_space<vmem>>, vector<1x128xf32>
    %37 = vector.broadcast %36 : vector<1x128xf32> to vector<16x128xf32>
    %38 = arith.addf %35, %37 : vector<16x128xf32>
    %c0_24 = arith.constant 0 : index
    %c0_25 = arith.constant 0 : index
    %39 = vector.load %arg6[%c0_24, %c0_25] : memref<16x128xf32, #tpu.memory_space<vmem>>, vector<16x128xf32>
    tpu.vector_store %arg6[%c0_24, %c0_25], %38 {strides = array<i32>} : memref<16x128xf32, #tpu.memory_space<vmem>>, vector<16x128xf32>,
    return
  }
  func.func @transform_0(%arg0: i32) -> (i32, i32, i32) {
    %c0_i32 = arith.constant 0 : i32
    %c0_i32_0 = arith.constant 0 : i32
    %c0_i32_1 = arith.constant 0 : i32
    return %c0_i32, %arg0, %c0_i32_0 : i32, i32, i32
  }
  func.func @transform_1(%arg0: i32) -> (i32, i32) {
    %c0_i32 = arith.constant 0 : i32
    %c0_i32_0 = arith.constant 0 : i32
    %c0_i32_1 = arith.constant 0 : i32
    return %c0_i32, %c0_i32_0 : i32, i32
  }
  func.func @transform_2(%arg0: i32) -> (i32, i32) {
    %c0_i32 = arith.constant 0 : i32
    %c0_i32_0 = arith.constant 0 : i32
    %c0_i32_1 = arith.constant 0 : i32
    return %c0_i32, %c0_i32_0 : i32, i32
  }
  func.func @transform_3(%arg0: i32) -> (i32, i32) {
    %c0_i32 = arith.constant 0 : i32
    %c0_i32_0 = arith.constant 0 : i32
    %c0_i32_1 = arith.constant 0 : i32
    return %c0_i32, %c0_i32_0 : i32, i32
  }
  func.func @transform_4(%arg0: i32) -> (i32, i32) {
    %c0_i32 = arith.constant 0 : i32
    %c0_i32_0 = arith.constant 0 : i32
    %c0_i32_1 = arith.constant 0 : i32
    return %c0_i32, %c0_i32_0 : i32, i32
  }
  func.func @transform_5(%arg0: i32) -> (i32, i32) {
    %c0_i32 = arith.constant 0 : i32
    %c0_i32_0 = arith.constant 0 : i32
    return %arg0, %c0_i32 : i32, i32
  }
}

</mosaic_0001>

<bundles_post_ra>
// kernel: _lambda_.4
= control target key start
LH: loop header
LB: loop body
LE: loop exit
PB: predicated region body
PF: predicated region fallthrough
CT: control target
= control target key end

     0   :  { %s1239_s12 = smov 0   ;;  %s1241_s13 = smov 0   ;;  %s1424_s0 = inlined_call_operand.vmem [shape: bf16[4,128,48], index: 0, kind: input, shape index: {}]   ;;  %s1425_s1 = inlined_call_operand.vmem [shape: bf16[48,128], index: 1, kind: input, shape index: {}]   ;;  %s1426_s2 = inlined_call_operand.vmem [shape: f32[1,128], index: 2, kind: input, shape index: {}]   ;;  %s1427_s3 = inlined_call_operand.vmem [shape: bf16[128,128], index: 3, kind: output, shape index: {}]  }
   0x1   :  { %s1243_s14 = smov 0  }
   0x2 LB: > { %s955_s15 = sadd.s32 4294967295, %s1217_s14   ;;  %s1256_s16 = sadd.s32 1, %s1217_s14   ;;  %s1217_s14 = sphi %s1243_s14, %s1430_s14   ;;  %s1213_s13 = sphi %s1241_s13, %s1429_s13   ;;  %s1209_s12 = sphi %s1239_s12, %s1428_s12  }
   0x3   : > { %s17_s17 = ssub.s32 %s1217_s14, %s1256_s16  ;;  %s20_s18 = sadd.s32 1, %s1213_s13 }
   0x4   : > { %p18_p0 = scmp.eq.s32.totalorder %s17_s17, 0  ;;  %p27_p1 = scmp.ne.s32.totalorder %s1213_s13, %s1209_s12 }
   0x5   : > { %p28_p2 = scmp.eq.s32.totalorder %s1217_s14, 0  ;;  %p958_p4 = scmp.ge.s32.totalorder %s1217_s14, 2 }
   0x6   : > { %s1265_s19 = scalar_select %p18_p0, %s1213_s13, %s20_s18  }
   0x7   : > { %p29_p3 = por %p28_p2, %p27_p1  ;;  %127 = sbr.rel (%p958_p4) target bundleno = 24 (0x18), region = 24 }
   0xc   : > { %130 = sbr.rel (!%p29_p3) target bundleno = 24 (0x18), region = 28  ;;  %s132_s20 = sand.u32 (%p29_p3), 1, %s1213_s13  }
   0xd   : > { %s1036_s21 = sshll.u32 (%p29_p3), %s1217_s14, 5  ;;  %s959_s22 = sshll.u32 (%p29_p3), %s132_s20, 7 }
   0xe   : > { %s1273_s25 = scalar_lea.vmem (%p29_p3), %s1424_s0, %s1036_s21  ;;  %s134_s26 = scalar_lea.vmem (%p29_p3), [#allocation2], %s959_s22 }
   0xf   : > { %v154_v0 = vld [vmem:[%s1273_s25] sm:$0xff] (%p29_p3)   ;;  %v158_v1 = vld [vmem:[%s1273_s25 + $0x8] sm:$0xff] (%p29_p3)   ;;  %v162_v2 = vld [vmem:[%s1273_s25 + $0x10] sm:$0xff] (%p29_p3)  }
  0x10   : > { %155 = vst [vmem:[%s134_s26] sm:$0xff] (%p29_p3), %v154_v0   ;;  %159 = vst [vmem:[%s134_s26 + $0x8] sm:$0xff] (%p29_p3), %v158_v1   ;;  %v166_v3 = vld [vmem:[%s1273_s25 + $0x18] sm:$0xff] (%p29_p3)   ;;  %v170_v4 = vld [vmem:[%s1273_s25 + $0x40] sm:$0xff] (%p29_p3)  }
  0x11   : > { %163 = vst [vmem:[%s134_s26 + $0x10] sm:$0xff] %v162_v2   ;;  %v174_v5 = vld [vmem:[%s1273_s25 + $0x48] sm:$0xff]   ;;  %167 = vst [vmem:[%s134_s26 + $0x18] sm:$0xff] %v166_v3   ;;  %v178_v6 = vld [vmem:[%s1273_s25 + $0x50] sm:$0xff]  }
  0x12   : > { %171 = vst [vmem:[%s134_s26 + $0x20] sm:$0xff] %v170_v4   ;;  %175 = vst [vmem:[%s134_s26 + $0x28] sm:$0xff] %v174_v5   ;;  %v182_v7 = vld [vmem:[%s1273_s25 + $0x58] sm:$0xff]   ;;  %v186_v8 = vld [vmem:[%s1273_s25 + $0x80] sm:$0xff]  }
  0x13   : > { %179 = vst [vmem:[%s134_s26 + $0x30] sm:$0xff] %v178_v6   ;;  %183 = vst [vmem:[%s134_s26 + $0x38] sm:$0xff] %v182_v7   ;;  %v190_v9 = vld [vmem:[%s1273_s25 + $0x88] sm:$0xff]   ;;  %v194_v10 = vld [vmem:[%s1273_s25 + $0x90] sm:$0xff]  }
  0x14   : > { %187 = vst [vmem:[%s134_s26 + $0x40] sm:$0xff] %v186_v8   ;;  %v198_v11 = vld [vmem:[%s1273_s25 + $0x98] sm:$0xff]   ;;  %191 = vst [vmem:[%s134_s26 + $0x48] sm:$0xff] %v190_v9   ;;  %v202_v12 = vld [vmem:[%s1273_s25 + $0xc0] sm:$0xff]  }
  0x15   : > { %195 = vst [vmem:[%s134_s26 + $0x50] sm:$0xff] %v194_v10   ;;  %199 = vst [vmem:[%s134_s26 + $0x58] sm:$0xff] %v198_v11   ;;  %v206_v13 = vld [vmem:[%s1273_s25 + $0xc8] sm:$0xff]   ;;  %v210_v14 = vld [vmem:[%s1273_s25 + $0xd0] sm:$0xff]  }
  0x16   : > { %203 = vst [vmem:[%s134_s26 + $0x60] sm:$0xff] %v202_v12   ;;  %207 = vst [vmem:[%s134_s26 + $0x68] sm:$0xff] %v206_v13   ;;  %v214_v15 = vld [vmem:[%s1273_s25 + $0xd8] sm:$0xff]  }
  0x17   : > { %211 = vst [vmem:[%s134_s26 + $0x70] sm:$0xff] %v210_v14   ;;  %215 = vst [vmem:[%s134_s26 + $0x78] sm:$0xff] %v214_v15  }
  0x18 PF: > { %p962_p5 = scmp.ge.s32.totalorder %s1217_s14, 1  ;;  %p304_p6 = scmp.lt.s32.totalorder %s1217_s14, 3 }
  0x1a   : > { %p305_p7 = pnand %p962_p5, %p304_p6 }
  0x1b   : > { %s311_s29 = sand.u32 (!%p305_p7), 1, %s1209_s12   ;;  %s1352_s11 = sshll.u32 (!%p305_p7), %s955_s15, 3 }
  0x1c   : > { %308 = sbr.rel (%p305_p7) target bundleno = 280 (0x118), region = 69  ;;  %s963_s5 = sshll.u32 (!%p305_p7), %s311_s29, 7 }
  0x1d   : > { %s1303_s8 = scalar_lea.vmem (!%p305_p7), [#allocation2], %s963_s5  ;;  %p336_p8 = scmp.lt.s32.totalorder (!%p305_p7), %s1352_s11, 15 }
  0x21   : > { %v1176_v16 = vld [vmem:[%s1425_s1 + $0x10] sm:$0xff]   ;;  %v1177_v17 = vld [vmem:[%s1425_s1 + $0x8] sm:$0xff]   ;;  %v1178_v18 = vld [vmem:[%s1425_s1] sm:$0xff]   ;;  %vm401_vm0 = vcmask 392192   ;;  %s1432_s11 = smov (!%p336_p8, %s1352_s11), 15 }
  0x22   : > { %1096 = vmatprep.subr.bf16.mxu0 %v1176_v16  ;;  %1110 = vmatprep.subr.bf16.mxu1 %v1176_v16  ;;  %v1179_v19 = vld [vmem:[%s1303_s8] sm:$0xff]   ;;  %v1181_v21 = vld [vmem:[%s1303_s8 + $0x8] sm:$0xff]   ;;  %v1183_v23 = vld [vmem:[%s1303_s8 + $0x10] sm:$0xff]   ;;  %s965_s12 = sshll.u32 %s1432_s11, 2 }
  0x23   : > { %1097 = vmatpush3.bf16.msra.mxu0 %v1176_v16  ;;  %1111 = vmatpush3.bf16.msra.mxu1 %v1176_v16  ;;  %v1180_v20 = vld [vmem:[%s1303_s8 + $0x20] sm:$0xff]   ;;  %v1182_v22 = vld [vmem:[%s1303_s8 + $0x28] sm:$0xff]   ;;  %v1184_v24 = vld [vmem:[%s1303_s8 + $0x30] sm:$0xff]   ;;  %s1401_s17 = scalar_lea.vmem %s1427_s3, %s965_s12 }
  0x24   : > { %1098 = vmatprep.subr.bf16.mxu0 %v1177_v17  ;;  %1112 = vmatprep.subr.bf16.mxu1 %v1177_v17  ;;  %v1185_v25 = vld [vmem:[%s1303_s8 + $0x18] sm:$0xff]   ;;  %v1187_v27 = vld [vmem:[%s1303_s8 + $0x40] sm:$0xff]   ;;  %v1189_v29 = vld [vmem:[%s1303_s8 + $0x48] sm:$0xff]  }
  0x25   : > { %1102 = vmatprep.mubr.msk.bf16.mxu0 %vm401_vm0, %v1179_v19  ;;  %1116 = vmatprep.mubr.msk.bf16.mxu1 %vm401_vm0, %v1180_v20  ;;  %v1186_v26 = vld [vmem:[%s1303_s8 + $0x38] sm:$0xff]   ;;  %v1188_v28 = vld [vmem:[%s1303_s8 + $0x60] sm:$0xff]   ;;  %v1190_v30 = vld [vmem:[%s1303_s8 + $0x68] sm:$0xff]  }
  0x26   : > { %v1191_v31 = vld [vmem:[%s1303_s8 + $0x50] sm:$0xff]   ;;  %v1193_v33 = vld [vmem:[%s1303_s8 + $0x58] sm:$0xff]   ;;  %v1340_v43 = vld [vmem:[%s1426_s2] ss:$0 sm:$0xff] }
  0x27   : > { %1099 = vmatpush3.bf16.msra.mxu0 %v1177_v17  ;;  %1113 = vmatpush3.bf16.msra.mxu1 %v1177_v17  ;;  %v1192_v32 = vld [vmem:[%s1303_s8 + $0x70] sm:$0xff]   ;;  %v1194_v34 = vld [vmem:[%s1303_s8 + $0x78] sm:$0xff]  }
  0x28   : > { %1100 = vmatprep.subr.bf16.mxu0 %v1178_v18  ;;  %1114 = vmatprep.subr.bf16.mxu1 %v1178_v18 }
  0x2b   : > { %1101 = vmatpush3.bf16.msra.mxu0 %v1178_v18  ;;  %1115 = vmatpush3.bf16.msra.mxu1 %v1178_v18 }
  0x2c   : > { %1124 = vmatprep.subr.bf16.mxu0 %v1176_v16  ;;  %1138 = vmatprep.subr.bf16.mxu1 %v1176_v16 }
  0x2e   : > { %1103 = vmatmul.mubr.msk.bf16.vlgmr.msra.gmra.mxu0 %vm401_vm0, %v1181_v21  ;;  %1117 = vmatmul.mubr.msk.bf16.vlgmr.msra.gmra.mxu1 %vm401_vm0, %v1182_v22 }
  0x2f   : > { %1125 = vmatpush3.bf16.msra.mxu0 %v1176_v16  ;;  %1139 = vmatpush3.bf16.msra.mxu1 %v1176_v16 }
  0x30   : > { %1126 = vmatprep.subr.bf16.mxu0 %v1177_v17  ;;  %1140 = vmatprep.subr.bf16.mxu1 %v1177_v17 }
  0x31   : > { %1106 = vmatprep.mubr.msk.bf16.mxu0 %vm401_vm0, %v1183_v23  ;;  %1120 = vmatprep.mubr.msk.bf16.mxu1 %vm401_vm0, %v1184_v24 }
  0x33   : > { %1127 = vmatpush3.bf16.msra.mxu0 %v1177_v17  ;;  %1141 = vmatpush3.bf16.msra.mxu1 %v1177_v17 }
  0x34   : > { %1128 = vmatprep.subr.bf16.mxu0 %v1178_v18  ;;  %1142 = vmatprep.subr.bf16.mxu1 %v1178_v18 }
  0x36   : > { %1107 = vmatmul.mubr.msk.bf16.gmra.mxu0 %vm401_vm0, %v1185_v25  ;;  %1121 = vmatmul.mubr.msk.bf16.gmra.mxu1 %vm401_vm0, %v1186_v26 }
  0x37   : > { %1129 = vmatpush3.bf16.msra.mxu0 %v1178_v18  ;;  %1143 = vmatpush3.bf16.msra.mxu1 %v1178_v18 }
  0x38   : > { %1130 = vmatprep.mubr.msk.bf16.mxu0 %vm401_vm0, %v1187_v27  ;;  %1144 = vmatprep.mubr.msk.bf16.mxu1 %vm401_vm0, %v1188_v28 }
  0x3e   : > { %1131 = vmatmul.mubr.msk.bf16.vlgmr.msra.gmra.mxu0 %vm401_vm0, %v1189_v29  ;;  %1145 = vmatmul.mubr.msk.bf16.vlgmr.msra.gmra.mxu1 %vm401_vm0, %v1190_v30 }
  0x3f   : > { %1134 = vmatprep.mubr.msk.bf16.mxu0 %vm401_vm0, %v1191_v31  ;;  %1148 = vmatprep.mubr.msk.bf16.mxu1 %vm401_vm0, %v1192_v32 }
  0x46   : > { %1135 = vmatmul.mubr.msk.bf16.gmra.mxu0 %vm401_vm0, %v1193_v33  ;;  %1149 = vmatmul.mubr.msk.bf16.gmra.mxu1 %vm401_vm0, %v1194_v34 }
  0xee   : > { %v1104_v35 = vpop.f32.mrf.mxu0  ;;  %v1118_v36 = vpop.f32.mrf.mxu1 }
  0xef   : > { %v457_v46 = vadd.f32 %v1104_v35, %v1340_v43  ;;  %v571_v47 = vadd.f32 %v1118_v36, %v1340_v43 }
  0xf0   : > { %v448_v37 = vpop.f32.mrf.mxu0  ;;  %v562_v38 = vpop.f32.mrf.mxu1 }
  0xf1   : > { %v449_v50 = vadd.f32 %v1340_v43, %v448_v37  ;;  %v563_v51 = vadd.f32 %v1340_v43, %v562_v38  ;;  %v481_v58 = vmax.f32 %v457_v46, 0.0  ;;  %v595_v59 = vmax.f32 %v571_v47, 0.0 }
  0xf2   : > { %v1105_v39 = vpop.f32.mrf.mxu0  ;;  %v1119_v40 = vpop.f32.mrf.mxu1 }
  0xf3   : > { %v460_v52 = vadd.f32 %v1105_v39, %v1340_v43  ;;  %v574_v53 = vadd.f32 %v1119_v40, %v1340_v43  ;;  %v479_v62 = vmax.f32 %v449_v50, 0.0  ;;  %v593_v63 = vmax.f32 %v563_v51, 0.0 }
  0xf4   : > { %v451_v41 = vpop.f32.mrf.mxu0  ;;  %v565_v42 = vpop.f32.mrf.mxu1  ;;  %v603_v8 = vmax.f32 %v481_v58, %v595_v59 }
  0xf5   : > { %v452_v56 = vadd.f32 %v1340_v43, %v451_v41  ;;  %v566_v57 = vadd.f32 %v1340_v43, %v565_v42  ;;  %v482_v0 = vmax.f32 %v460_v52, 0.0  ;;  %v596_v1 = vmax.f32 %v574_v53, 0.0 }
  0xf6   : > { %v1108_v44 = vpop.f32.mrf.mxu0  ;;  %v1122_v45 = vpop.f32.mrf.mxu1  ;;  %v1366_v14 = vmax.f32 %v479_v62, %v593_v63 }
  0xf7   : > { %v480_v4 = vmax.f32 %v452_v56, 0.0  ;;  %v594_v5 = vmax.f32 %v566_v57, 0.0  ;;  %v1355_v6 = vadd.f32 %v1108_v44, %v1340_v43  ;;  %v1360_v9 = vadd.f32 %v1122_v45, %v1340_v43 }
  0xf8   : > { %v464_v48 = vpop.f32.mrf.mxu0  ;;  %v578_v49 = vpop.f32.mrf.mxu1  ;;  %v604_v18 = vmax.f32 %v482_v0, %v596_v1 }
  0xf9   : > { %v1363_v10 = vadd.f32 %v1340_v43, %v464_v48  ;;  %v1371_v19 = vadd.f32 %v1340_v43, %v578_v49  ;;  %v602_v24 = vmax.f32 %v480_v4, %v594_v5  ;;  %v485_v25 = vmax.f32 %v1355_v6, 0.0 }
  0xfa   : > { %v1109_v54 = vpop.f32.mrf.mxu0  ;;  %v1123_v55 = vpop.f32.mrf.mxu1  ;;  %v599_v28 = vmax.f32 %v1360_v9, 0.0 }
  0xfb   : > { %v1374_v20 = vadd.f32 %v1109_v54, %v1340_v43  ;;  %v483_v29 = vmax.f32 %v1363_v10, 0.0  ;;  %v597_v38 = vmax.f32 %v1371_v19, 0.0  ;;  %v590_v40 = vadd.f32 %v1123_v55, %v1340_v43 }
  0xfc   : > { %v467_v60 = vpop.f32.mrf.mxu0  ;;  %v581_v61 = vpop.f32.mrf.mxu1 }
  0xfd   : > { %v486_v39 = vmax.f32 %v1374_v20, 0.0  ;;  %v468_v45 = vadd.f32 %v1340_v43, %v467_v60  ;;  %v582_v49 = vadd.f32 %v1340_v43, %v581_v61  ;;  %v600_v59 = vmax.f32 %v590_v40, 0.0 }
  0xfe   : > { %v1132_v2 = vpop.f32.mrf.mxu0  ;;  %v1146_v3 = vpop.f32.mrf.mxu1 }
  0xff   : > { %v693_v7 = vadd.f32 %v1132_v2, %v1340_v43  ;;  %v807_v11 = vadd.f32 %v1146_v3, %v1340_v43  ;;  %v484_v5 = vmax.f32 %v468_v45, 0.0 }
 0x100   : > { %v684_v12 = vpop.f32.mrf.mxu0  ;;  %v798_v13 = vpop.f32.mrf.mxu1 }
 0x101   : > { %v717_v15 = vmax.f32 %v693_v7, 0.0  ;;  %v685_v16 = vadd.f32 %v1340_v43, %v684_v12  ;;  %v799_v17 = vadd.f32 %v1340_v43, %v798_v13  ;;  %v831_v21 = vmax.f32 %v807_v11, 0.0 }
 0x102   : > { %v1133_v22 = vpop.f32.mrf.mxu0  ;;  %v1147_v23 = vpop.f32.mrf.mxu1  ;;  %v598_v12 = vmax.f32 %v582_v49, 0.0 }
 0x103   : > { %v696_v26 = vadd.f32 %v1133_v22, %v1340_v43  ;;  %v810_v27 = vadd.f32 %v1147_v23, %v1340_v43  ;;  %v715_v30 = vmax.f32 %v685_v16, 0.0  ;;  %v829_v31 = vmax.f32 %v799_v17, 0.0 }
 0x104   : > { %v687_v32 = vpop.f32.mrf.mxu0  ;;  %v801_v33 = vpop.f32.mrf.mxu1  ;;  %v839_v34 = vmax.f32 %v717_v15, %v831_v21  ;;  %v607_v22 = vmax.f32 %v485_v25, %v599_v28  ;;  %v608_v23 = vmax.f32 %v486_v39, %v600_v59 }
 0x105   : > { %v718_v35 = vmax.f32 %v696_v26, 0.0  ;;  %v832_v36 = vmax.f32 %v810_v27, 0.0  ;;  %v688_v37 = vadd.f32 %v1340_v43, %v687_v32  ;;  %v802_v41 = vadd.f32 %v1340_v43, %v801_v33 }
 0x106   : > { %v1136_v42 = vpop.f32.mrf.mxu0  ;;  %v1150_v44 = vpop.f32.mrf.mxu1  ;;  %v837_v50 = vmax.f32 %v715_v30, %v829_v31  ;;  %v847_v55 = vmax.f32 %v603_v8, %v839_v34  ;;  %v605_v26 = vmax.f32 %v483_v29, %v597_v38  ;;  %v606_v27 = vmax.f32 %v484_v5, %v598_v12 }
 0x107   : > { %v840_v46 = vmax.f32 %v718_v35, %v832_v36  ;;  %v716_v47 = vmax.f32 %v688_v37, 0.0  ;;  %v709_v48 = vadd.f32 %v1136_v42, %v1340_v43  ;;  %v830_v51 = vmax.f32 %v802_v41, 0.0 }
 0x108   : > { %v823_v52 = vadd.f32 %v1150_v44, %v1340_v43  ;;  %v700_v53 = vpop.f32.mrf.mxu0  ;;  %v814_v54 = vpop.f32.mrf.mxu1  ;;  %v845_v7 = vmax.f32 %v1366_v14, %v837_v50 }
 0x109   : > { %v848_v56 = vmax.f32 %v604_v18, %v840_v46  ;;  %v701_v57 = vadd.f32 %v1340_v43, %v700_v53  ;;  %v815_v58 = vadd.f32 %v1340_v43, %v814_v54  ;;  %v838_v60 = vmax.f32 %v716_v47, %v830_v51 }
 0x10a   : > { %v721_v61 = vmax.f32 %v709_v48, 0.0  ;;  %v835_v62 = vmax.f32 %v823_v52, 0.0  ;;  %v1137_v63 = vpop.f32.mrf.mxu0  ;;  %v1151_v0 = vpop.f32.mrf.mxu1 }
 0x10b   : > { %v1053_v1 = vpack.c.bf16 %v848_v56, %v847_v55  ;;  %v719_v2 = vmax.f32 %v701_v57, 0.0  ;;  %v833_v3 = vmax.f32 %v815_v58, 0.0  ;;  %v712_v4 = vadd.f32 %v1137_v63, %v1340_v43 }
 0x10c   : > { %v846_v8 = vmax.f32 %v602_v24, %v838_v60  ;;  %v826_v9 = vadd.f32 %v1151_v0, %v1340_v43  ;;  %v703_v10 = vpop.f32.mrf.mxu0  ;;  %v817_v11 = vpop.f32.mrf.mxu1  ;;  %v843_v18 = vmax.f32 %v721_v61, %v835_v62 }
 0x10d   : > { %1065 = vst [vmem:[%s1401_s17 + $0x8] sm:$0xff] %v1053_v1   ;;  %v722_v13 = vmax.f32 %v712_v4, 0.0  ;;  %v704_v15 = vadd.f32 %v1340_v43, %v703_v10  ;;  %v818_v16 = vadd.f32 %v1340_v43, %v817_v11  ;;  %v841_v20 = vmax.f32 %v719_v2, %v833_v3 }
 0x10e   : > { %v1048_v17 = vpack.c.bf16 %v846_v8, %v845_v7  ;;  %v836_v19 = vmax.f32 %v826_v9, 0.0  ;;  %v851_v31 = vmax.f32 %v607_v22, %v843_v18 }
 0x10f   : > { %v720_v21 = vmax.f32 %v704_v15, 0.0  ;;  %v834_v14 = vmax.f32 %v818_v16, 0.0  ;;  %v849_v43 = vmax.f32 %v605_v26, %v841_v20 }
 0x110   : > { %1049 = vst [vmem:[%s1401_s17] sm:$0xff] %v1048_v17   ;;  %v844_v24 = vmax.f32 %v722_v13, %v836_v19 }
 0x111   : > { %v842_v30 = vmax.f32 %v720_v21, %v834_v14 }
 0x112   : > { %v852_v32 = vmax.f32 %v608_v23, %v844_v24 }
 0x113   : > { %v850_v33 = vmax.f32 %v606_v27, %v842_v30 }
 0x114   : > { %v1063_v34 = vpack.c.bf16 %v852_v32, %v851_v31 }
 0x115   : > { %v1058_v35 = vpack.c.bf16 %v850_v33, %v849_v43 }
 0x116   : > { %1067 = vst [vmem:[%s1401_s17 + $0x18] sm:$0xff] %v1063_v34  }
 0x117   : > { %1066 = vst [vmem:[%s1401_s17 + $0x10] sm:$0xff] %v1058_v35  }
 0x118 PF: > { %p10_p9 = scmp.ge.s32.totalorder %s1256_s16, 4   ;;  %s1428_s12 = smov %s1213_s13 }
 0x119   : > { %s1429_s13 = smov %s1265_s19  ;;  %s1430_s14 = smov %s1256_s16 }
 0x11a   :  { %12 = sbr.rel (!%p10_p9) target bundleno = 2 (0x2), region = 111 }

// kernel: _lambda_.5
= control target key start
LH: loop header
LB: loop body
LE: loop exit
PB: predicated region body
PF: predicated region fallthrough
CT: control target
= control target key end

     0   :  { %s1221_s12 = smov 0   ;;  %s1223_s13 = smov 0   ;;  %s1490_s0 = inlined_call_operand.vmem [shape: bf16[4,32,288], index: 0, kind: input, shape index: {}]   ;;  %s1491_s1 = inlined_call_operand.vmem [shape: bf16[288,128], index: 1, kind: input, shape index: {}]   ;;  %s1492_s2 = inlined_call_operand.vmem [shape: f32[1,128], index: 2, kind: input, shape index: {}]   ;;  %s1493_s3 = inlined_call_operand.vmem [shape: bf16[32,128], index: 3, kind: output, shape index: {}]  }
   0x1   :  { %s1225_s14 = smov 0  }
   0x2 LB: > { %s896_s15 = sadd.s32 4294967295, %s1197_s14   ;;  %s1238_s16 = sadd.s32 1, %s1197_s14   ;;  %s1197_s14 = sphi %s1225_s14, %s1496_s14   ;;  %s1193_s13 = sphi %s1223_s13, %s1495_s13   ;;  %s1189_s12 = sphi %s1221_s12, %s1494_s12  }
   0x3   : > { %s17_s17 = ssub.s32 %s1197_s14, %s1238_s16  ;;  %s20_s18 = sadd.s32 1, %s1193_s13 }
   0x4   : > { %p18_p0 = scmp.eq.s32.totalorder %s17_s17, 0  ;;  %p27_p1 = scmp.ne.s32.totalorder %s1193_s13, %s1189_s12 }
   0x5   : > { %p28_p2 = scmp.eq.s32.totalorder %s1197_s14, 0  ;;  %p899_p4 = scmp.ge.s32.totalorder %s1197_s14, 2 }
   0x6   : > { %s1247_s19 = scalar_select %p18_p0, %s1193_s13, %s20_s18  }
   0x7   : > { %p29_p3 = por %p28_p2, %p27_p1  ;;  %127 = sbr.rel (%p899_p4) target bundleno = 26 (0x1a), region = 24 }
   0xc   : > { %130 = sbr.rel (!%p29_p3) target bundleno = 26 (0x1a), region = 28  ;;  %s132_s20 = sand.u32 (%p29_p3), 1, %s1193_s13  }
   0xd   : > { %s1113_s21 = smul.u32 (%p29_p3), 24, %s1197_s14 }
   0xe   : > { %s1112_s22 = smul.u32 (%p29_p3), 96, %s132_s20 }
   0xf   : > { %s1255_s25 = scalar_lea.vmem (%p29_p3), %s1490_s0, %s1113_s21 }
  0x10   : > { %v153_v0 = vld [vmem:[%s1255_s25] sm:$0xff] (%p29_p3)  ;;  %v155_v1 = vld [vmem:[%s1255_s25 + $0xc] sm:$0xff] (%p29_p3)  ;;  %s134_s26 = scalar_lea.vmem (%p29_p3), [#allocation2], %s1112_s22  ;;  %v903_v8 = vld [vmem:[%s1255_s25 + $0x8] sm:$0xf] (%p29_p3) }
  0x11   : > { %v157_v2 = vld [vmem:[%s1255_s25 + $0x30] sm:$0xff]  ;;  %154 = vst [vmem:[%s134_s26] sm:$0xff] %v153_v0  ;;  %156 = vst [vmem:[%s134_s26 + $0xc] sm:$0xff] %v155_v1  ;;  %v159_v3 = vld [vmem:[%s1255_s25 + $0x3c] sm:$0xff] }
  0x12   : > { %158 = vst [vmem:[%s134_s26 + $0x18] sm:$0xff] %v157_v2  ;;  %v161_v4 = vld [vmem:[%s1255_s25 + $0x60] sm:$0xff]  ;;  %v163_v5 = vld [vmem:[%s1255_s25 + $0x6c] sm:$0xff]  ;;  %160 = vst [vmem:[%s134_s26 + $0x24] sm:$0xff] %v159_v3 }
  0x13   : > { %162 = vst [vmem:[%s134_s26 + $0x30] sm:$0xff] %v161_v4  ;;  %164 = vst [vmem:[%s134_s26 + $0x3c] sm:$0xff] %v163_v5  ;;  %v165_v6 = vld [vmem:[%s1255_s25 + $0x90] sm:$0xff]  ;;  %v167_v7 = vld [vmem:[%s1255_s25 + $0x9c] sm:$0xff] }
  0x14   : > { %166 = vst [vmem:[%s134_s26 + $0x48] sm:$0xff] %v165_v6  ;;  %168 = vst [vmem:[%s134_s26 + $0x54] sm:$0xff] %v167_v7  ;;  %v905_v9 = vld [vmem:[%s1255_s25 + $0x14] sm:$0xf]  ;;  %v907_v10 = vld [vmem:[%s1255_s25 + $0x38] sm:$0xf] }
  0x15   : > { %904 = vst [vmem:[%s134_s26 + $0x8] sm:$0xf] %v903_v8  ;;  %v909_v11 = vld [vmem:[%s1255_s25 + $0x44] sm:$0xf]  ;;  %906 = vst [vmem:[%s134_s26 + $0x14] sm:$0xf] %v905_v9 }
  0x16   : > { %908 = vst [vmem:[%s134_s26 + $0x20] sm:$0xf] %v907_v10  ;;  %910 = vst [vmem:[%s134_s26 + $0x2c] sm:$0xf] %v909_v11  ;;  %v911_v12 = vld [vmem:[%s1255_s25 + $0x68] sm:$0xf] }
  0x17   : > { %v913_v13 = vld [vmem:[%s1255_s25 + $0x74] sm:$0xf]  ;;  %v915_v14 = vld [vmem:[%s1255_s25 + $0x98] sm:$0xf]  ;;  %912 = vst [vmem:[%s134_s26 + $0x38] sm:$0xf] %v911_v12 }
  0x18   : > { %914 = vst [vmem:[%s134_s26 + $0x44] sm:$0xf] %v913_v13  ;;  %916 = vst [vmem:[%s134_s26 + $0x50] sm:$0xf] %v915_v14  ;;  %v917_v15 = vld [vmem:[%s1255_s25 + $0xa4] sm:$0xf] }
  0x19   : > { %918 = vst [vmem:[%s134_s26 + $0x5c] sm:$0xf] %v917_v15 }
  0x1a PF: > { %p919_p5 = scmp.ge.s32.totalorder %s1197_s14, 1  ;;  %p197_p6 = scmp.lt.s32.totalorder %s1197_s14, 3 }
  0x1c   : > { %p198_p7 = pnand %p919_p5, %p197_p6 }
  0x1d   : > { %s204_s6 = sand.u32 (!%p198_p7), 1, %s1189_s12   ;;  %s920_s24 = sshll.u32 (!%p198_p7), %s896_s15, 1 }
  0x1e   : > { %201 = sbr.rel (%p198_p7) target bundleno = 330 (0x14a), region = 54  ;;  %p229_p8 = scmp.lt.s32.totalorder (!%p198_p7), %s920_s24, 3 }
  0x1f   : > { %s1114_s9 = smul.u32 (!%p198_p7), 96, %s204_s6 }
  0x21   : > { %s1314_s18 = scalar_lea.vmem (!%p198_p7), [#allocation2], %s1114_s9 }
  0x23   : > { %v1278_v16 = vld [vmem:[%s1491_s1 + $0x78] sm:$0xff]   ;;  %v1199_v17 = vmov 0.0   ;;  %v1284_v18 = vld [vmem:[%s1491_s1 + $0x88] sm:$0xff]   ;;  %vm1200_vm0 = vmmov 0   ;;  %v1299_v20 = vld [vmem:[%s1491_s1 + $0x70] sm:$0xff]   ;;  %vm405_vm1 = vcmask 261120  }
  0x24   : > { %1080 = vmatprep.subr.bf16.mxu1 %v1199_v17  ;;  %980 = vmatprep.subr.bf16.mxu0 %v1278_v16  ;;  %v1290_v19 = vld [vmem:[%s1491_s1 + $0x38] sm:$0xff]   ;;  %v1306_v21 = vld [vmem:[%s1491_s1 + $0x80] sm:$0xff]   ;;  %v1312_v22 = vld [vmem:[%s1491_s1 + $0x30] sm:$0xff]   ;;  %s1498_s24 = smov (!%p229_p8, %s920_s24), 3 }
  0x25   : > { %1084 = vmatprep.mubr.msk.bf16.mxu1 %vm1200_vm0, %v1199_v17  ;;  %1081 = vmatpush3.bf16.msra.mxu1 %v1284_v18  ;;  %v1147_v23 = vld [vmem:[%s1314_s18 + $0x8] ss:$12 sps:$4 sm:$0xff]   ;;  %v1334_v26 = vld [vmem:[%s1491_s1 + $0x60] sm:$0xff]   ;;  %v1349_v28 = vld [vmem:[%s1491_s1 + $0x58] sm:$0xff]   ;;  %s921_s14 = sshll.u32 %s1498_s24, 2 }
  0x26   : > { %981 = vmatpush3.bf16.msra.mxu0 %v1290_v19  ;;  %1082 = vmatprep.subr.bf16.mxu1 %v1199_v17  ;;  %v1321_v24 = vld [vmem:[%s1491_s1 + $0x68] sm:$0xff]   ;;  %v1343_v27 = vld [vmem:[%s1491_s1 + $0x20] sm:$0xff]   ;;  %v1357_v29 = vld [vmem:[%s1491_s1 + $0x18] sm:$0xff]   ;;  %s232_s26 = scalar_lea.vmem %s1493_s3, %s921_s14 }
  0x27   : > { %982 = vmatprep.subr.bf16.mxu0 %v1299_v20  ;;  %v1328_v25 = vld [vmem:[%s1491_s1 + $0x28] sm:$0xff]   ;;  %v1363_v30 = vld [vmem:[%s1491_s1 + $0x50] sm:$0xff]   ;;  %v1393_v36 = vld [vmem:[%s1491_s1 + $0x40] sm:$0xff]  }
  0x28   : > { %v1369_v31 = vld [vmem:[%s1491_s1 + $0x10] sm:$0xff]   ;;  %v1378_v33 = vld [vmem:[%s1491_s1 + $0x48] sm:$0xff]   ;;  %v1401_v37 = vld [vmem:[%s1491_s1] sm:$0xff]  }
  0x29   : > { %1083 = vmatpush3.bf16.msra.mxu1 %v1306_v21  ;;  %v1162_v32 = vld [vmem:[%s1314_s18 + $0x4] ss:$12 sps:$4 sm:$0xff]   ;;  %v1165_v34 = vld [vmem:[%s1314_s18 + $0x1c] ss:$12 sps:$4 sm:$0xff]   ;;  %v1160_v38 = vld [vmem:[%s1314_s18] ss:$12 sps:$4 sm:$0xff]  }
  0x2a   : > { %983 = vmatpush3.bf16.msra.mxu0 %v1312_v22  ;;  %1005 = vmatprep.subr.bf16.mxu1 %v1278_v16  ;;  %v1387_v35 = vld [vmem:[%s1491_s1 + $0x8] sm:$0xff]   ;;  %v1163_v39 = vld [vmem:[%s1314_s18 + $0x18] ss:$12 sps:$4 sm:$0xff]   ;;  %v1170_v41 = vld [vmem:[%s1314_s18 + $0x34] ss:$12 sps:$4 sm:$0xff]  }
  0x2b   : > { %984 = vmatprep.subr.bf16.mxu0 %v1321_v24  ;;  %441 = vmatprep.mubr.bf16.mxu0 %v1162_v32  ;;  %v1166_v40 = vld [vmem:[%s1314_s18 + $0x20] ss:$12 sps:$4 sm:$0xff]   ;;  %v1167_v42 = vld [vmem:[%s1314_s18 + $0x38] ss:$12 sps:$4 sm:$0xff]   ;;  %v1168_v44 = vld [vmem:[%s1314_s18 + $0x30] ss:$12 sps:$4 sm:$0xff]  }
  0x2c   : > { %1085 = vmatmul.mubr.msk.bf16.vlgmr.msra.gmra.mxu1 %vm405_vm1, %v1147_v23  ;;  %v1173_v43 = vld [vmem:[%s1314_s18 + $0x4c] ss:$12 sps:$4 sm:$0xff]   ;;  %v1171_v45 = vld [vmem:[%s1314_s18 + $0x48] ss:$12 sps:$4 sm:$0xff]   ;;  %v1174_v46 = vld [vmem:[%s1314_s18 + $0x50] ss:$12 sps:$4 sm:$0xff]  }
  0x2d   : > { %1006 = vmatpush3.bf16.msra.mxu1 %v1290_v19  ;;  %548 = vmatprep.mubr.bf16.mxu1 %v1165_v34  ;;  %v922_v12 = vld [vmem:[%s1492_s2] ss:$0 sm:$0xff] }
  0x2e   : > { %985 = vmatpush3.bf16.msra.mxu0 %v1328_v25  ;;  %1007 = vmatprep.subr.bf16.mxu1 %v1299_v20 }
  0x2f   : > { %986 = vmatprep.subr.bf16.mxu0 %v1334_v26 }
  0x31   : > { %1008 = vmatpush3.bf16.msra.mxu1 %v1312_v22 }
  0x32   : > { %987 = vmatpush3.bf16.msra.mxu0 %v1343_v27  ;;  %1009 = vmatprep.subr.bf16.mxu1 %v1321_v24 }
  0x33   : > { %988 = vmatprep.subr.bf16.mxu0 %v1349_v28 }
  0x35   : > { %1010 = vmatpush3.bf16.msra.mxu1 %v1328_v25 }
  0x36   : > { %989 = vmatpush3.bf16.msra.mxu0 %v1357_v29  ;;  %1011 = vmatprep.subr.bf16.mxu1 %v1334_v26 }
  0x37   : > { %990 = vmatprep.subr.bf16.mxu0 %v1363_v30 }
  0x39   : > { %1012 = vmatpush3.bf16.msra.mxu1 %v1343_v27 }
  0x3a   : > { %991 = vmatpush3.bf16.msra.mxu0 %v1369_v31  ;;  %1013 = vmatprep.subr.bf16.mxu1 %v1349_v28 }
  0x3b   : > { %992 = vmatprep.subr.bf16.mxu0 %v1378_v33 }
  0x3d   : > { %1014 = vmatpush3.bf16.msra.mxu1 %v1357_v29 }
  0x3e   : > { %993 = vmatpush3.bf16.msra.mxu0 %v1387_v35  ;;  %1015 = vmatprep.subr.bf16.mxu1 %v1363_v30 }
  0x3f   : > { %994 = vmatprep.subr.bf16.mxu0 %v1393_v36 }
  0x41   : > { %1016 = vmatpush3.bf16.msra.mxu1 %v1369_v31 }
  0x42   : > { %995 = vmatpush3.bf16.msra.mxu0 %v1401_v37  ;;  %1017 = vmatprep.subr.bf16.mxu1 %v1378_v33 }
  0x43   : > { %1088 = vmatprep.subr.bf16.mxu0 %v1199_v17 }
  0x45   : > { %442 = vmatmul.mubr.bf16.vlgmr.msra.gmra.mxu0 %v1160_v38  ;;  %1018 = vmatpush3.bf16.msra.mxu1 %v1387_v35 }
  0x46   : > { %1089 = vmatpush3.bf16.msra.mxu0 %v1284_v18  ;;  %1019 = vmatprep.subr.bf16.mxu1 %v1393_v36 }
  0x47   : > { %1090 = vmatprep.subr.bf16.mxu0 %v1199_v17  ;;  %1092 = vmatprep.mubr.msk.bf16.mxu0 %vm1200_vm0, %v1199_v17 }
  0x49   : > { %1020 = vmatpush3.bf16.msra.mxu1 %v1401_v37 }
  0x4a   : > { %1091 = vmatpush3.bf16.msra.mxu0 %v1306_v21  ;;  %1096 = vmatprep.subr.bf16.mxu1 %v1199_v17 }
  0x4b   : > { %1030 = vmatprep.subr.bf16.mxu0 %v1278_v16 }
  0x4c   : > { %549 = vmatmul.mubr.bf16.vlgmr.msra.gmra.mxu1 %v1163_v39 }
  0x4d   : > { %1093 = vmatmul.mubr.msk.bf16.vlgmr.msra.gmra.mxu0 %vm405_vm1, %v1166_v40  ;;  %1097 = vmatpush3.bf16.msra.mxu1 %v1284_v18 }
  0x4e   : > { %1031 = vmatpush3.bf16.msra.mxu0 %v1290_v19  ;;  %1098 = vmatprep.subr.bf16.mxu1 %v1199_v17 }
  0x4f   : > { %1032 = vmatprep.subr.bf16.mxu0 %v1299_v20  ;;  %1100 = vmatprep.mubr.msk.bf16.mxu1 %vm1200_vm0, %v1199_v17 }
  0x50   : > { %657 = vmatprep.mubr.bf16.mxu0 %v1170_v41 }
  0x51   : > { %1099 = vmatpush3.bf16.msra.mxu1 %v1306_v21 }
  0x52   : > { %1033 = vmatpush3.bf16.msra.mxu0 %v1312_v22  ;;  %1055 = vmatprep.subr.bf16.mxu1 %v1278_v16 }
  0x53   : > { %1034 = vmatprep.subr.bf16.mxu0 %v1321_v24 }
  0x54   : > { %1101 = vmatmul.mubr.msk.bf16.vlgmr.msra.gmra.mxu1 %vm405_vm1, %v1167_v42 }
  0x55   : > { %1056 = vmatpush3.bf16.msra.mxu1 %v1290_v19  ;;  %764 = vmatprep.mubr.bf16.mxu1 %v1173_v43 }
  0x56   : > { %1035 = vmatpush3.bf16.msra.mxu0 %v1328_v25  ;;  %1057 = vmatprep.subr.bf16.mxu1 %v1299_v20 }
  0x57   : > { %1036 = vmatprep.subr.bf16.mxu0 %v1334_v26 }
  0x59   : > { %1058 = vmatpush3.bf16.msra.mxu1 %v1312_v22 }
  0x5a   : > { %1037 = vmatpush3.bf16.msra.mxu0 %v1343_v27  ;;  %1059 = vmatprep.subr.bf16.mxu1 %v1321_v24 }
  0x5b   : > { %1038 = vmatprep.subr.bf16.mxu0 %v1349_v28 }
  0x5d   : > { %1060 = vmatpush3.bf16.msra.mxu1 %v1328_v25 }
  0x5e   : > { %1039 = vmatpush3.bf16.msra.mxu0 %v1357_v29  ;;  %1061 = vmatprep.subr.bf16.mxu1 %v1334_v26 }
  0x5f   : > { %1040 = vmatprep.subr.bf16.mxu0 %v1363_v30 }
  0x61   : > { %1062 = vmatpush3.bf16.msra.mxu1 %v1343_v27 }
  0x62   : > { %1041 = vmatpush3.bf16.msra.mxu0 %v1369_v31  ;;  %1063 = vmatprep.subr.bf16.mxu1 %v1349_v28 }
  0x63   : > { %1042 = vmatprep.subr.bf16.mxu0 %v1378_v33 }
  0x65   : > { %1064 = vmatpush3.bf16.msra.mxu1 %v1357_v29 }
  0x66   : > { %1043 = vmatpush3.bf16.msra.mxu0 %v1387_v35  ;;  %1065 = vmatprep.subr.bf16.mxu1 %v1363_v30 }
  0x67   : > { %1044 = vmatprep.subr.bf16.mxu0 %v1393_v36 }
  0x69   : > { %1066 = vmatpush3.bf16.msra.mxu1 %v1369_v31 }
  0x6a   : > { %1045 = vmatpush3.bf16.msra.mxu0 %v1401_v37  ;;  %1067 = vmatprep.subr.bf16.mxu1 %v1378_v33 }
  0x6b   : > { %1104 = vmatprep.subr.bf16.mxu0 %v1199_v17 }
  0x6d   : > { %658 = vmatmul.mubr.bf16.vlgmr.msra.gmra.mxu0 %v1168_v44  ;;  %1068 = vmatpush3.bf16.msra.mxu1 %v1387_v35 }
  0x6e   : > { %1105 = vmatpush3.bf16.msra.mxu0 %v1284_v18  ;;  %1069 = vmatprep.subr.bf16.mxu1 %v1393_v36 }
  0x6f   : > { %1106 = vmatprep.subr.bf16.mxu0 %v1199_v17  ;;  %1108 = vmatprep.mubr.msk.bf16.mxu0 %vm1200_vm0, %v1199_v17 }
  0x71   : > { %1070 = vmatpush3.bf16.msra.mxu1 %v1401_v37 }
  0x72   : > { %1107 = vmatpush3.bf16.msra.mxu0 %v1306_v21 }
  0x74   : > { %765 = vmatmul.mubr.bf16.vlgmr.msra.gmra.mxu1 %v1171_v45 }
  0x75   : > { %1109 = vmatmul.mubr.msk.bf16.vlgmr.msra.gmra.mxu0 %vm405_vm1, %v1174_v46 }
  0xec   : > { %v484_v47 = vpop.f32.mrf.mxu1 }
  0xee   : > { %v1086_v48 = vpop.f32.mrf.mxu1 }
  0xf0   : > { %v487_v49 = vpop.f32.mrf.mxu1 }
  0xf2   : > { %v1087_v50 = vpop.f32.mrf.mxu1 }
 0x105   : > { %v996_v51 = vpop.f32.mrf.mxu0 }
 0x107   : > { %v997_v52 = vpop.f32.mrf.mxu0 }
 0x108   : > { %v998_v10 = vadd.f32 %v997_v52, %v996_v51 }
 0x109   : > { %v999_v53 = vpop.f32.mrf.mxu0 }
 0x10a   : > { %v444_v22 = vadd.f32 %v998_v10, %v922_v12 }
 0x10b   : > { %v1000_v54 = vpop.f32.mrf.mxu0 }
 0x10c   : > { %v1021_v55 = vpop.f32.mrf.mxu1  ;;  %v1001_v13 = vadd.f32 %v1000_v54, %v999_v53  ;;  %v485_v35 = vadd.f32 %v484_v47, %v444_v22 }
 0x10d   : > { %v591_v56 = vpop.f32.mrf.mxu0 }
 0x10e   : > { %v1022_v57 = vpop.f32.mrf.mxu1  ;;  %v447_v24 = vadd.f32 %v1001_v13, %v922_v12  ;;  %v491_v44 = vmax.f32 %v485_v35, 0.0 }
 0x10f   : > { %v1094_v58 = vpop.f32.mrf.mxu0  ;;  %v1023_v6 = vadd.f32 %v1022_v57, %v1021_v55 }
 0x110   : > { %v1024_v59 = vpop.f32.mrf.mxu1  ;;  %v488_v36 = vadd.f32 %v487_v49, %v447_v24 }
 0x111   : > { %v594_v60 = vpop.f32.mrf.mxu0  ;;  %v551_v16 = vadd.f32 %v1023_v6, %v922_v12 }
 0x112   : > { %v1025_v61 = vpop.f32.mrf.mxu1  ;;  %v492_v45 = vmax.f32 %v488_v36, 0.0 }
 0x113   : > { %v1095_v62 = vpop.f32.mrf.mxu0  ;;  %v1026_v7 = vadd.f32 %v1025_v61, %v1024_v59  ;;  %v592_v28 = vadd.f32 %v591_v56, %v551_v16 }
 0x114   : > { %v700_v63 = vpop.f32.mrf.mxu1 }
 0x115   : > { %v554_v18 = vadd.f32 %v1026_v7, %v922_v12  ;;  %v598_v40 = vmax.f32 %v592_v28, 0.0 }
 0x116   : > { %v1102_v0 = vpop.f32.mrf.mxu1 }
 0x117   : > { %v595_v30 = vadd.f32 %v594_v60, %v554_v18  ;;  %v600_v51 = vmax.f32 %v491_v44, %v598_v40 }
 0x118   : > { %v703_v1 = vpop.f32.mrf.mxu1 }
 0x119   : > { %v599_v41 = vmax.f32 %v595_v30, 0.0 }
 0x11a   : > { %v1103_v2 = vpop.f32.mrf.mxu1 }
 0x11b   : > { %v601_v52 = vmax.f32 %v492_v45, %v599_v41 }
 0x12d   : > { %v1046_v3 = vpop.f32.mrf.mxu0 }
 0x12f   : > { %v1047_v4 = vpop.f32.mrf.mxu0 }
 0x130   : > { %v1048_v8 = vadd.f32 %v1047_v4, %v1046_v3 }
 0x131   : > { %v1049_v5 = vpop.f32.mrf.mxu0 }
 0x132   : > { %v660_v19 = vadd.f32 %v1048_v8, %v922_v12 }
 0x133   : > { %v1050_v9 = vpop.f32.mrf.mxu0 }
 0x134   : > { %v1071_v11 = vpop.f32.mrf.mxu1  ;;  %v1051_v14 = vadd.f32 %v1050_v9, %v1049_v5  ;;  %v701_v31 = vadd.f32 %v700_v63, %v660_v19 }
 0x135   : > { %v807_v15 = vpop.f32.mrf.mxu0 }
 0x136   : > { %v1072_v17 = vpop.f32.mrf.mxu1  ;;  %v663_v25 = vadd.f32 %v1051_v14, %v922_v12  ;;  %v707_v42 = vmax.f32 %v701_v31, 0.0 }
 0x137   : > { %v1073_v20 = vadd.f32 %v1072_v17, %v1071_v11  ;;  %v1110_v21 = vpop.f32.mrf.mxu0 }
 0x138   : > { %v1074_v23 = vpop.f32.mrf.mxu1  ;;  %v704_v37 = vadd.f32 %v703_v1, %v663_v25 }
 0x139   : > { %v767_v26 = vadd.f32 %v1073_v20, %v922_v12  ;;  %v810_v27 = vpop.f32.mrf.mxu0 }
 0x13a   : > { %v1075_v29 = vpop.f32.mrf.mxu1  ;;  %v708_v46 = vmax.f32 %v704_v37, 0.0 }
 0x13b   : > { %v808_v32 = vadd.f32 %v807_v15, %v767_v26  ;;  %v1076_v33 = vadd.f32 %v1075_v29, %v1074_v23  ;;  %v1111_v34 = vpop.f32.mrf.mxu0 }
 0x13d   : > { %v814_v38 = vmax.f32 %v808_v32, 0.0  ;;  %v770_v39 = vadd.f32 %v1076_v33, %v922_v12 }
 0x13f   : > { %v811_v43 = vadd.f32 %v810_v27, %v770_v39  ;;  %v816_v48 = vmax.f32 %v707_v42, %v814_v38 }
 0x141   : > { %v815_v50 = vmax.f32 %v811_v43, 0.0  ;;  %v818_v54 = vmax.f32 %v600_v51, %v816_v48 }
 0x143   : > { %v817_v53 = vmax.f32 %v708_v46, %v815_v50 }
 0x145   : > { %v819_v47 = vmax.f32 %v601_v52, %v817_v53 }
 0x147   : > { %v978_v49 = vpack.c.bf16 %v819_v47, %v818_v54 }
 0x149   : > { %979 = vst [vmem:[%s232_s26] sm:$0xff] %v978_v49  }
 0x14a PF: > { %p10_p9 = scmp.ge.s32.totalorder %s1238_s16, 4   ;;  %s1494_s12 = smov %s1193_s13 }
 0x14b   : > { %s1495_s13 = smov %s1247_s19  ;;  %s1496_s14 = smov %s1238_s16 }
 0x14c   :  { %12 = sbr.rel (!%p10_p9) target bundleno = 2 (0x2), region = 102 }

// kernel: _lambda_.6
= control target key start
LH: loop header
LB: loop body
LE: loop exit
PB: predicated region body
PF: predicated region fallthrough
CT: control target
= control target key end

     0   :  { %v838_v0 = vmov 0.0   ;;  %vm839_vm0 = vmmov 0   ;;  %vm185_vm1 = vcmask 261120   ;;  %s1084_s1 = inlined_call_operand.vmem [shape: bf16[288,128], index: 1, kind: input, shape index: {}]   ;;  %s1085_s0 = inlined_call_operand.vmem [shape: bf16[4,16,288], index: 0, kind: input, shape index: {}]   ;;  %s1086_s2 = inlined_call_operand.vmem [shape: f32[1,128], index: 2, kind: input, shape index: {}]   ;;  %s1087_s3 = inlined_call_operand.vmem [shape: bf16[16,128], index: 3, kind: output, shape index: {}]  }
   0x1   :  { %770 = vmatprep.subr.bf16.mxu1 %v838_v0  ;;  %v864_v1 = vld [vmem:[%s1084_s1 + $0x78] sm:$0xff]   ;;  %774 = vmatprep.mubr.msk.bf16.mxu1 %vm839_vm0, %v838_v0  ;;  %v871_v2 = vld [vmem:[%s1084_s1 + $0x88] sm:$0xff]   ;;  %v883_v4 = vld [vmem:[%s1084_s1 + $0x70] sm:$0xff]  }
   0x2   :  { %670 = vmatprep.subr.bf16.mxu0 %v864_v1  ;;  %v877_v3 = vld [vmem:[%s1084_s1 + $0x38] sm:$0xff]   ;;  %771 = vmatpush3.bf16.msra.mxu1 %v871_v2  ;;  %v890_v5 = vld [vmem:[%s1084_s1 + $0x80] sm:$0xff]   ;;  %v896_v6 = vld [vmem:[%s1084_s1 + $0x30] sm:$0xff]  }
   0x3   :  { %671 = vmatpush3.bf16.msra.mxu0 %v877_v3  ;;  %772 = vmatprep.subr.bf16.mxu1 %v838_v0  ;;  %v810_v7 = vld [vmem:[%s1085_s0 + $0x8] ss:$12 sps:$4 sm:$0xff]   ;;  %v918_v10 = vld [vmem:[%s1084_s1 + $0x60] sm:$0xff]   ;;  %v933_v12 = vld [vmem:[%s1084_s1 + $0x58] sm:$0xff]  }
   0x4   :  { %672 = vmatprep.subr.bf16.mxu0 %v883_v4  ;;  %v905_v8 = vld [vmem:[%s1084_s1 + $0x68] sm:$0xff]   ;;  %v927_v11 = vld [vmem:[%s1084_s1 + $0x20] sm:$0xff]   ;;  %v941_v13 = vld [vmem:[%s1084_s1 + $0x18] sm:$0xff]  }
   0x5   :  { %v912_v9 = vld [vmem:[%s1084_s1 + $0x28] sm:$0xff]   ;;  %v947_v14 = vld [vmem:[%s1084_s1 + $0x50] sm:$0xff]   ;;  %v981_v20 = vld [vmem:[%s1084_s1 + $0x40] sm:$0xff]  }
   0x6   :  { %773 = vmatpush3.bf16.msra.mxu1 %v890_v5  ;;  %v953_v15 = vld [vmem:[%s1084_s1 + $0x10] sm:$0xff]   ;;  %v964_v17 = vld [vmem:[%s1084_s1 + $0x48] sm:$0xff]   ;;  %v989_v21 = vld [vmem:[%s1084_s1] sm:$0xff]  }
   0x7   :  { %673 = vmatpush3.bf16.msra.mxu0 %v896_v6  ;;  %695 = vmatprep.subr.bf16.mxu1 %v864_v1  ;;  %v825_v16 = vld [vmem:[%s1085_s0 + $0x4] ss:$12 sps:$4 sm:$0xff]   ;;  %v828_v18 = vld [vmem:[%s1085_s0 + $0x1c] ss:$12 sps:$4 sm:$0xff]   ;;  %v823_v22 = vld [vmem:[%s1085_s0] ss:$12 sps:$4 sm:$0xff]  }
   0x8   :  { %674 = vmatprep.subr.bf16.mxu0 %v905_v8  ;;  %221 = vmatprep.mubr.bf16.mxu0 %v825_v16  ;;  %v975_v19 = vld [vmem:[%s1084_s1 + $0x8] sm:$0xff]   ;;  %v826_v23 = vld [vmem:[%s1085_s0 + $0x18] ss:$12 sps:$4 sm:$0xff]   ;;  %v833_v25 = vld [vmem:[%s1085_s0 + $0x34] ss:$12 sps:$4 sm:$0xff]  }
   0x9   :  { %775 = vmatmul.mubr.msk.bf16.vlgmr.msra.gmra.mxu1 %vm185_vm1, %v810_v7  ;;  %v829_v24 = vld [vmem:[%s1085_s0 + $0x20] ss:$12 sps:$4 sm:$0xff]   ;;  %v830_v26 = vld [vmem:[%s1085_s0 + $0x38] ss:$12 sps:$4 sm:$0xff]   ;;  %v831_v28 = vld [vmem:[%s1085_s0 + $0x30] ss:$12 sps:$4 sm:$0xff]  }
   0xa   :  { %696 = vmatpush3.bf16.msra.mxu1 %v877_v3  ;;  %328 = vmatprep.mubr.bf16.mxu1 %v828_v18  ;;  %v836_v27 = vld [vmem:[%s1085_s0 + $0x4c] ss:$12 sps:$4 sm:$0xff]   ;;  %v834_v29 = vld [vmem:[%s1085_s0 + $0x48] ss:$12 sps:$4 sm:$0xff]   ;;  %v837_v30 = vld [vmem:[%s1085_s0 + $0x50] ss:$12 sps:$4 sm:$0xff]  }
   0xb   :  { %675 = vmatpush3.bf16.msra.mxu0 %v912_v9  ;;  %697 = vmatprep.subr.bf16.mxu1 %v883_v4  ;;  %v614_v60 = vld [vmem:[%s1086_s2] ss:$0 sm:$0xff] }
   0xc   :  { %676 = vmatprep.subr.bf16.mxu0 %v918_v10 }
   0xe   :  { %698 = vmatpush3.bf16.msra.mxu1 %v896_v6 }
   0xf   :  { %677 = vmatpush3.bf16.msra.mxu0 %v927_v11  ;;  %699 = vmatprep.subr.bf16.mxu1 %v905_v8 }
  0x10   :  { %678 = vmatprep.subr.bf16.mxu0 %v933_v12 }
  0x12   :  { %700 = vmatpush3.bf16.msra.mxu1 %v912_v9 }
  0x13   :  { %679 = vmatpush3.bf16.msra.mxu0 %v941_v13  ;;  %701 = vmatprep.subr.bf16.mxu1 %v918_v10 }
  0x14   :  { %680 = vmatprep.subr.bf16.mxu0 %v947_v14 }
  0x16   :  { %702 = vmatpush3.bf16.msra.mxu1 %v927_v11 }
  0x17   :  { %681 = vmatpush3.bf16.msra.mxu0 %v953_v15  ;;  %703 = vmatprep.subr.bf16.mxu1 %v933_v12 }
  0x18   :  { %682 = vmatprep.subr.bf16.mxu0 %v964_v17 }
  0x1a   :  { %704 = vmatpush3.bf16.msra.mxu1 %v941_v13 }
  0x1b   :  { %683 = vmatpush3.bf16.msra.mxu0 %v975_v19  ;;  %705 = vmatprep.subr.bf16.mxu1 %v947_v14 }
  0x1c   :  { %684 = vmatprep.subr.bf16.mxu0 %v981_v20 }
  0x1e   :  { %706 = vmatpush3.bf16.msra.mxu1 %v953_v15 }
  0x1f   :  { %685 = vmatpush3.bf16.msra.mxu0 %v989_v21  ;;  %707 = vmatprep.subr.bf16.mxu1 %v964_v17 }
  0x20   :  { %778 = vmatprep.subr.bf16.mxu0 %v838_v0 }
  0x22   :  { %222 = vmatmul.mubr.bf16.vlgmr.msra.gmra.mxu0 %v823_v22  ;;  %708 = vmatpush3.bf16.msra.mxu1 %v975_v19 }
  0x23   :  { %779 = vmatpush3.bf16.msra.mxu0 %v871_v2  ;;  %709 = vmatprep.subr.bf16.mxu1 %v981_v20 }
  0x24   :  { %780 = vmatprep.subr.bf16.mxu0 %v838_v0  ;;  %782 = vmatprep.mubr.msk.bf16.mxu0 %vm839_vm0, %v838_v0 }
  0x26   :  { %710 = vmatpush3.bf16.msra.mxu1 %v989_v21 }
  0x27   :  { %781 = vmatpush3.bf16.msra.mxu0 %v890_v5  ;;  %786 = vmatprep.subr.bf16.mxu1 %v838_v0 }
  0x28   :  { %720 = vmatprep.subr.bf16.mxu0 %v864_v1 }
  0x29   :  { %329 = vmatmul.mubr.bf16.vlgmr.msra.gmra.mxu1 %v826_v23 }
  0x2a   :  { %783 = vmatmul.mubr.msk.bf16.vlgmr.msra.gmra.mxu0 %vm185_vm1, %v829_v24  ;;  %787 = vmatpush3.bf16.msra.mxu1 %v871_v2 }
  0x2b   :  { %721 = vmatpush3.bf16.msra.mxu0 %v877_v3  ;;  %788 = vmatprep.subr.bf16.mxu1 %v838_v0 }
  0x2c   :  { %722 = vmatprep.subr.bf16.mxu0 %v883_v4  ;;  %790 = vmatprep.mubr.msk.bf16.mxu1 %vm839_vm0, %v838_v0 }
  0x2d   :  { %437 = vmatprep.mubr.bf16.mxu0 %v833_v25 }
  0x2e   :  { %789 = vmatpush3.bf16.msra.mxu1 %v890_v5 }
  0x2f   :  { %723 = vmatpush3.bf16.msra.mxu0 %v896_v6  ;;  %745 = vmatprep.subr.bf16.mxu1 %v864_v1 }
  0x30   :  { %724 = vmatprep.subr.bf16.mxu0 %v905_v8 }
  0x31   :  { %791 = vmatmul.mubr.msk.bf16.vlgmr.msra.gmra.mxu1 %vm185_vm1, %v830_v26 }
  0x32   :  { %746 = vmatpush3.bf16.msra.mxu1 %v877_v3  ;;  %544 = vmatprep.mubr.bf16.mxu1 %v836_v27 }
  0x33   :  { %725 = vmatpush3.bf16.msra.mxu0 %v912_v9  ;;  %747 = vmatprep.subr.bf16.mxu1 %v883_v4 }
  0x34   :  { %726 = vmatprep.subr.bf16.mxu0 %v918_v10 }
  0x36   :  { %748 = vmatpush3.bf16.msra.mxu1 %v896_v6 }
  0x37   :  { %727 = vmatpush3.bf16.msra.mxu0 %v927_v11  ;;  %749 = vmatprep.subr.bf16.mxu1 %v905_v8 }
  0x38   :  { %728 = vmatprep.subr.bf16.mxu0 %v933_v12 }
  0x3a   :  { %750 = vmatpush3.bf16.msra.mxu1 %v912_v9 }
  0x3b   :  { %729 = vmatpush3.bf16.msra.mxu0 %v941_v13  ;;  %751 = vmatprep.subr.bf16.mxu1 %v918_v10 }
  0x3c   :  { %730 = vmatprep.subr.bf16.mxu0 %v947_v14 }
  0x3e   :  { %752 = vmatpush3.bf16.msra.mxu1 %v927_v11 }
  0x3f   :  { %731 = vmatpush3.bf16.msra.mxu0 %v953_v15  ;;  %753 = vmatprep.subr.bf16.mxu1 %v933_v12 }
  0x40   :  { %732 = vmatprep.subr.bf16.mxu0 %v964_v17 }
  0x42   :  { %754 = vmatpush3.bf16.msra.mxu1 %v941_v13 }
  0x43   :  { %733 = vmatpush3.bf16.msra.mxu0 %v975_v19  ;;  %755 = vmatprep.subr.bf16.mxu1 %v947_v14 }
  0x44   :  { %734 = vmatprep.subr.bf16.mxu0 %v981_v20 }
  0x46   :  { %756 = vmatpush3.bf16.msra.mxu1 %v953_v15 }
  0x47   :  { %735 = vmatpush3.bf16.msra.mxu0 %v989_v21  ;;  %757 = vmatprep.subr.bf16.mxu1 %v964_v17 }
  0x48   :  { %794 = vmatprep.subr.bf16.mxu0 %v838_v0 }
  0x4a   :  { %438 = vmatmul.mubr.bf16.vlgmr.msra.gmra.mxu0 %v831_v28  ;;  %758 = vmatpush3.bf16.msra.mxu1 %v975_v19 }
  0x4b   :  { %795 = vmatpush3.bf16.msra.mxu0 %v871_v2  ;;  %759 = vmatprep.subr.bf16.mxu1 %v981_v20 }
  0x4c   :  { %796 = vmatprep.subr.bf16.mxu0 %v838_v0  ;;  %798 = vmatprep.mubr.msk.bf16.mxu0 %vm839_vm0, %v838_v0 }
  0x4e   :  { %760 = vmatpush3.bf16.msra.mxu1 %v989_v21 }
  0x4f   :  { %797 = vmatpush3.bf16.msra.mxu0 %v890_v5 }
  0x51   :  { %545 = vmatmul.mubr.bf16.vlgmr.msra.gmra.mxu1 %v834_v29 }
  0x52   :  { %799 = vmatmul.mubr.msk.bf16.vlgmr.msra.gmra.mxu0 %vm185_vm1, %v837_v30 }
  0xc9   :  { %v264_v31 = vpop.f32.mrf.mxu1 }
  0xcb   :  { %v776_v32 = vpop.f32.mrf.mxu1 }
  0xcd   :  { %v267_v33 = vpop.f32.mrf.mxu1 }
  0xcf   :  { %v777_v34 = vpop.f32.mrf.mxu1 }
  0xe2   :  { %v686_v35 = vpop.f32.mrf.mxu0 }
  0xe4   :  { %v687_v36 = vpop.f32.mrf.mxu0 }
  0xe5   :  { %v688_v58 = vadd.f32 %v687_v36, %v686_v35 }
  0xe6   :  { %v689_v37 = vpop.f32.mrf.mxu0 }
  0xe7   :  { %v224_v6 = vadd.f32 %v688_v58, %v614_v60 }
  0xe8   :  { %v690_v38 = vpop.f32.mrf.mxu0 }
  0xe9   :  { %v711_v39 = vpop.f32.mrf.mxu1  ;;  %v691_v61 = vadd.f32 %v690_v38, %v689_v37  ;;  %v265_v19 = vadd.f32 %v264_v31, %v224_v6 }
  0xea   :  { %v371_v40 = vpop.f32.mrf.mxu0 }
  0xeb   :  { %v712_v41 = vpop.f32.mrf.mxu1  ;;  %v227_v8 = vadd.f32 %v691_v61, %v614_v60  ;;  %v271_v28 = vmax.f32 %v265_v19, 0.0 }
  0xec   :  { %v784_v42 = vpop.f32.mrf.mxu0  ;;  %v713_v54 = vadd.f32 %v712_v41, %v711_v39 }
  0xed   :  { %v714_v43 = vpop.f32.mrf.mxu1  ;;  %v268_v20 = vadd.f32 %v267_v33, %v227_v8 }
  0xee   :  { %v374_v44 = vpop.f32.mrf.mxu0  ;;  %v331_v0 = vadd.f32 %v713_v54, %v614_v60 }
  0xef   :  { %v715_v45 = vpop.f32.mrf.mxu1  ;;  %v272_v29 = vmax.f32 %v268_v20, 0.0 }
  0xf0   :  { %v785_v46 = vpop.f32.mrf.mxu0  ;;  %v716_v55 = vadd.f32 %v715_v45, %v714_v43  ;;  %v372_v12 = vadd.f32 %v371_v40, %v331_v0 }
  0xf1   :  { %v480_v47 = vpop.f32.mrf.mxu1 }
  0xf2   :  { %v334_v2 = vadd.f32 %v716_v55, %v614_v60  ;;  %v378_v24 = vmax.f32 %v372_v12, 0.0 }
  0xf3   :  { %v792_v48 = vpop.f32.mrf.mxu1 }
  0xf4   :  { %v375_v14 = vadd.f32 %v374_v44, %v334_v2  ;;  %v380_v35 = vmax.f32 %v271_v28, %v378_v24 }
  0xf5   :  { %v483_v49 = vpop.f32.mrf.mxu1 }
  0xf6   :  { %v379_v25 = vmax.f32 %v375_v14, 0.0 }
  0xf7   :  { %v793_v50 = vpop.f32.mrf.mxu1 }
  0xf8   :  { %v381_v36 = vmax.f32 %v272_v29, %v379_v25 }
 0x10a   :  { %v736_v51 = vpop.f32.mrf.mxu0 }
 0x10c   :  { %v737_v52 = vpop.f32.mrf.mxu0 }
 0x10d   :  { %v738_v56 = vadd.f32 %v737_v52, %v736_v51 }
 0x10e   :  { %v739_v53 = vpop.f32.mrf.mxu0 }
 0x10f   :  { %v440_v3 = vadd.f32 %v738_v56, %v614_v60 }
 0x110   :  { %v740_v57 = vpop.f32.mrf.mxu0 }
 0x111   :  { %v761_v59 = vpop.f32.mrf.mxu1  ;;  %v741_v62 = vadd.f32 %v740_v57, %v739_v53  ;;  %v481_v15 = vadd.f32 %v480_v47, %v440_v3 }
 0x112   :  { %v587_v63 = vpop.f32.mrf.mxu0 }
 0x113   :  { %v762_v1 = vpop.f32.mrf.mxu1  ;;  %v443_v9 = vadd.f32 %v741_v62, %v614_v60  ;;  %v487_v26 = vmax.f32 %v481_v15, 0.0 }
 0x114   :  { %v763_v4 = vadd.f32 %v762_v1, %v761_v59  ;;  %v800_v5 = vpop.f32.mrf.mxu0 }
 0x115   :  { %v764_v7 = vpop.f32.mrf.mxu1  ;;  %v484_v21 = vadd.f32 %v483_v49, %v443_v9 }
 0x116   :  { %v547_v10 = vadd.f32 %v763_v4, %v614_v60  ;;  %v590_v11 = vpop.f32.mrf.mxu0 }
 0x117   :  { %v765_v13 = vpop.f32.mrf.mxu1  ;;  %v488_v30 = vmax.f32 %v484_v21, 0.0 }
 0x118   :  { %v588_v16 = vadd.f32 %v587_v63, %v547_v10  ;;  %v766_v17 = vadd.f32 %v765_v13, %v764_v7  ;;  %v801_v18 = vpop.f32.mrf.mxu0 }
 0x11a   :  { %v594_v22 = vmax.f32 %v588_v16, 0.0  ;;  %v550_v23 = vadd.f32 %v766_v17, %v614_v60 }
 0x11c   :  { %v591_v27 = vadd.f32 %v590_v11, %v550_v23  ;;  %v596_v32 = vmax.f32 %v487_v26, %v594_v22 }
 0x11e   :  { %v595_v34 = vmax.f32 %v591_v27, 0.0  ;;  %v598_v38 = vmax.f32 %v380_v35, %v596_v32 }
 0x120   :  { %v597_v37 = vmax.f32 %v488_v30, %v595_v34 }
 0x122   :  { %v599_v39 = vmax.f32 %v381_v36, %v597_v37 }
 0x124   :  { %v668_v40 = vpack.c.bf16 %v599_v39, %v598_v38 }
 0x126   :  { %669 = vst [vmem:[%s1087_s3] sm:$0xff] %v668_v40  }

// kernel: _lambda_.7
= control target key start
LH: loop header
LB: loop body
LE: loop exit
PB: predicated region body
PF: predicated region fallthrough
CT: control target
= control target key end

     0   :  { %v986_v0 = vmov 0.0   ;;  %vm987_vm0 = vmmov 0   ;;  %vm191_vm1 = vcmask 261120   ;;  %s1282_s1 = inlined_call_operand.vmem [shape: bf16[288,128], index: 1, kind: input, shape index: {}]   ;;  %s1283_s0 = inlined_call_operand.vmem [shape: bf16[4,16,288], index: 0, kind: input, shape index: {}]   ;;  %s1284_s3 = inlined_call_operand.vmem [shape: bf16[128,128], index: 3, kind: input, shape index: {}]   ;;  %s1285_s2 = inlined_call_operand.vmem [shape: f32[1,128], index: 2, kind: input, shape index: {}]   ;;  %s1286_s4 = inlined_call_operand.vmem [shape: f32[1,128], index: 4, kind: input, shape index: {}]   ;;  %s1287_s5 = inlined_call_operand.vmem [shape: f32[16,128], index: 5, kind: output, shape index: {}]  }
   0x1   :  { %890 = vmatprep.subr.bf16.mxu1 %v986_v0  ;;  %v1022_v1 = vld [vmem:[%s1282_s1 + $0x78] sm:$0xff]   ;;  %894 = vmatprep.mubr.msk.bf16.mxu1 %vm987_vm0, %v986_v0  ;;  %v1029_v2 = vld [vmem:[%s1282_s1 + $0x88] sm:$0xff]   ;;  %v1041_v4 = vld [vmem:[%s1282_s1 + $0x70] sm:$0xff]  }
   0x2   :  { %781 = vmatprep.subr.bf16.mxu0 %v1022_v1  ;;  %v1035_v3 = vld [vmem:[%s1282_s1 + $0x38] sm:$0xff]   ;;  %891 = vmatpush3.bf16.msra.mxu1 %v1029_v2  ;;  %v1048_v5 = vld [vmem:[%s1282_s1 + $0x80] sm:$0xff]   ;;  %v1054_v6 = vld [vmem:[%s1282_s1 + $0x30] sm:$0xff]  }
   0x3   :  { %782 = vmatpush3.bf16.msra.mxu0 %v1035_v3  ;;  %892 = vmatprep.subr.bf16.mxu1 %v986_v0  ;;  %v950_v7 = vld [vmem:[%s1283_s0 + $0x8] ss:$12 sps:$4 sm:$0xff]   ;;  %v1076_v10 = vld [vmem:[%s1282_s1 + $0x60] sm:$0xff]   ;;  %v1091_v12 = vld [vmem:[%s1282_s1 + $0x58] sm:$0xff]  }
   0x4   :  { %783 = vmatprep.subr.bf16.mxu0 %v1041_v4  ;;  %v1063_v8 = vld [vmem:[%s1282_s1 + $0x68] sm:$0xff]   ;;  %v1085_v11 = vld [vmem:[%s1282_s1 + $0x20] sm:$0xff]   ;;  %v1099_v13 = vld [vmem:[%s1282_s1 + $0x18] sm:$0xff]  }
   0x5   :  { %v1070_v9 = vld [vmem:[%s1282_s1 + $0x28] sm:$0xff]   ;;  %v1105_v14 = vld [vmem:[%s1282_s1 + $0x50] sm:$0xff]   ;;  %v1139_v20 = vld [vmem:[%s1282_s1 + $0x40] sm:$0xff]  }
   0x6   :  { %893 = vmatpush3.bf16.msra.mxu1 %v1048_v5  ;;  %v1111_v15 = vld [vmem:[%s1282_s1 + $0x10] sm:$0xff]   ;;  %v1122_v17 = vld [vmem:[%s1282_s1 + $0x48] sm:$0xff]   ;;  %v1147_v21 = vld [vmem:[%s1282_s1] sm:$0xff]  }
   0x7   :  { %784 = vmatpush3.bf16.msra.mxu0 %v1054_v6  ;;  %806 = vmatprep.subr.bf16.mxu1 %v1022_v1  ;;  %v965_v16 = vld [vmem:[%s1283_s0 + $0x4] ss:$12 sps:$4 sm:$0xff]   ;;  %v968_v18 = vld [vmem:[%s1283_s0 + $0x1c] ss:$12 sps:$4 sm:$0xff]   ;;  %v963_v22 = vld [vmem:[%s1283_s0] ss:$12 sps:$4 sm:$0xff]  }
   0x8   :  { %785 = vmatprep.subr.bf16.mxu0 %v1063_v8  ;;  %227 = vmatprep.mubr.bf16.mxu0 %v965_v16  ;;  %v1133_v19 = vld [vmem:[%s1282_s1 + $0x8] sm:$0xff]   ;;  %v973_v23 = vld [vmem:[%s1283_s0 + $0x34] ss:$12 sps:$4 sm:$0xff]   ;;  %v966_v24 = vld [vmem:[%s1283_s0 + $0x18] ss:$12 sps:$4 sm:$0xff]  }
   0x9   :  { %895 = vmatmul.mubr.msk.bf16.vlgmr.msra.gmra.mxu1 %vm191_vm1, %v950_v7  ;;  %v969_v25 = vld [vmem:[%s1283_s0 + $0x20] ss:$12 sps:$4 sm:$0xff]   ;;  %v970_v26 = vld [vmem:[%s1283_s0 + $0x38] ss:$12 sps:$4 sm:$0xff]   ;;  %v971_v28 = vld [vmem:[%s1283_s0 + $0x30] ss:$12 sps:$4 sm:$0xff]  }
   0xa   :  { %807 = vmatpush3.bf16.msra.mxu1 %v1035_v3  ;;  %334 = vmatprep.mubr.bf16.mxu1 %v968_v18  ;;  %v976_v27 = vld [vmem:[%s1283_s0 + $0x4c] ss:$12 sps:$4 sm:$0xff]   ;;  %v974_v29 = vld [vmem:[%s1283_s0 + $0x48] ss:$12 sps:$4 sm:$0xff]   ;;  %v977_v30 = vld [vmem:[%s1283_s0 + $0x50] ss:$12 sps:$4 sm:$0xff]  }
   0xb   :  { %786 = vmatpush3.bf16.msra.mxu0 %v1070_v9  ;;  %808 = vmatprep.subr.bf16.mxu1 %v1041_v4  ;;  %v978_v31 = vld [vmem:[%s1284_s3 + $0x38] sm:$0xff]   ;;  %v979_v32 = vld [vmem:[%s1284_s3 + $0x30] sm:$0xff]   ;;  %v980_v33 = vld [vmem:[%s1284_s3 + $0x28] sm:$0xff]  }
   0xc   :  { %787 = vmatprep.subr.bf16.mxu0 %v1076_v10  ;;  %v981_v34 = vld [vmem:[%s1284_s3 + $0x20] sm:$0xff]   ;;  %v982_v35 = vld [vmem:[%s1284_s3 + $0x18] sm:$0xff]   ;;  %v983_v36 = vld [vmem:[%s1284_s3 + $0x10] sm:$0xff]  }
   0xd   :  { %v984_v37 = vld [vmem:[%s1284_s3 + $0x8] sm:$0xff]   ;;  %v985_v38 = vld [vmem:[%s1284_s3] sm:$0xff]  }
   0xe   :  { %809 = vmatpush3.bf16.msra.mxu1 %v1054_v6 }
   0xf   :  { %788 = vmatpush3.bf16.msra.mxu0 %v1085_v11  ;;  %810 = vmatprep.subr.bf16.mxu1 %v1063_v8 }
  0x10   :  { %789 = vmatprep.subr.bf16.mxu0 %v1091_v12 }
  0x12   :  { %811 = vmatpush3.bf16.msra.mxu1 %v1070_v9 }
  0x13   :  { %790 = vmatpush3.bf16.msra.mxu0 %v1099_v13  ;;  %812 = vmatprep.subr.bf16.mxu1 %v1076_v10 }
  0x14   :  { %791 = vmatprep.subr.bf16.mxu0 %v1105_v14 }
  0x16   :  { %813 = vmatpush3.bf16.msra.mxu1 %v1085_v11 }
  0x17   :  { %792 = vmatpush3.bf16.msra.mxu0 %v1111_v15  ;;  %814 = vmatprep.subr.bf16.mxu1 %v1091_v12 }
  0x18   :  { %793 = vmatprep.subr.bf16.mxu0 %v1122_v17 }
  0x1a   :  { %815 = vmatpush3.bf16.msra.mxu1 %v1099_v13 }
  0x1b   :  { %794 = vmatpush3.bf16.msra.mxu0 %v1133_v19  ;;  %816 = vmatprep.subr.bf16.mxu1 %v1105_v14 }
  0x1c   :  { %795 = vmatprep.subr.bf16.mxu0 %v1139_v20 }
  0x1e   :  { %817 = vmatpush3.bf16.msra.mxu1 %v1111_v15 }
  0x1f   :  { %796 = vmatpush3.bf16.msra.mxu0 %v1147_v21  ;;  %818 = vmatprep.subr.bf16.mxu1 %v1122_v17 }
  0x20   :  { %831 = vmatprep.subr.bf16.mxu0 %v1022_v1 }
  0x22   :  { %228 = vmatmul.mubr.bf16.vlgmr.msra.gmra.mxu0 %v963_v22  ;;  %819 = vmatpush3.bf16.msra.mxu1 %v1133_v19 }
  0x23   :  { %832 = vmatpush3.bf16.msra.mxu0 %v1035_v3  ;;  %820 = vmatprep.subr.bf16.mxu1 %v1139_v20 }
  0x24   :  { %833 = vmatprep.subr.bf16.mxu0 %v1041_v4  ;;  %443 = vmatprep.mubr.bf16.mxu0 %v973_v23 }
  0x26   :  { %821 = vmatpush3.bf16.msra.mxu1 %v1147_v21 }
  0x27   :  { %834 = vmatpush3.bf16.msra.mxu0 %v1054_v6  ;;  %898 = vmatprep.subr.bf16.mxu1 %v986_v0 }
  0x28   :  { %835 = vmatprep.subr.bf16.mxu0 %v1063_v8 }
  0x29   :  { %335 = vmatmul.mubr.bf16.vlgmr.msra.gmra.mxu1 %v966_v24 }
  0x2a   :  { %899 = vmatpush3.bf16.msra.mxu1 %v1029_v2  ;;  %902 = vmatprep.mubr.msk.bf16.mxu1 %vm987_vm0, %v986_v0 }
  0x2b   :  { %836 = vmatpush3.bf16.msra.mxu0 %v1070_v9  ;;  %900 = vmatprep.subr.bf16.mxu1 %v986_v0 }
  0x2c   :  { %837 = vmatprep.subr.bf16.mxu0 %v1076_v10 }
  0x2e   :  { %901 = vmatpush3.bf16.msra.mxu1 %v1048_v5 }
  0x2f   :  { %838 = vmatpush3.bf16.msra.mxu0 %v1085_v11  ;;  %906 = vmatprep.subr.bf16.mxu1 %v986_v0 }
  0x30   :  { %839 = vmatprep.subr.bf16.mxu0 %v1091_v12 }
  0x31   :  { %903 = vmatmul.mubr.msk.bf16.vlgmr.msra.gmra.mxu1 %vm191_vm1, %v969_v25 }
  0x32   :  { %907 = vmatpush3.bf16.msra.mxu1 %v1029_v2  ;;  %910 = vmatprep.mubr.msk.bf16.mxu1 %vm987_vm0, %v986_v0 }
  0x33   :  { %840 = vmatpush3.bf16.msra.mxu0 %v1099_v13  ;;  %908 = vmatprep.subr.bf16.mxu1 %v986_v0 }
  0x34   :  { %841 = vmatprep.subr.bf16.mxu0 %v1105_v14 }
  0x36   :  { %909 = vmatpush3.bf16.msra.mxu1 %v1048_v5 }
  0x37   :  { %842 = vmatpush3.bf16.msra.mxu0 %v1111_v15  ;;  %856 = vmatprep.subr.bf16.mxu1 %v1022_v1 }
  0x38   :  { %843 = vmatprep.subr.bf16.mxu0 %v1122_v17 }
  0x39   :  { %911 = vmatmul.mubr.msk.bf16.vlgmr.msra.gmra.mxu1 %vm191_vm1, %v970_v26 }
  0x3a   :  { %857 = vmatpush3.bf16.msra.mxu1 %v1035_v3  ;;  %550 = vmatprep.mubr.bf16.mxu1 %v976_v27 }
  0x3b   :  { %844 = vmatpush3.bf16.msra.mxu0 %v1133_v19  ;;  %858 = vmatprep.subr.bf16.mxu1 %v1041_v4 }
  0x3c   :  { %845 = vmatprep.subr.bf16.mxu0 %v1139_v20 }
  0x3e   :  { %859 = vmatpush3.bf16.msra.mxu1 %v1054_v6 }
  0x3f   :  { %846 = vmatpush3.bf16.msra.mxu0 %v1147_v21  ;;  %860 = vmatprep.subr.bf16.mxu1 %v1063_v8 }
  0x40   :  { %922 = vmatprep.subr.bf16.mxu0 %v986_v0 }
  0x42   :  { %444 = vmatmul.mubr.bf16.vlgmr.msra.gmra.mxu0 %v971_v28  ;;  %861 = vmatpush3.bf16.msra.mxu1 %v1070_v9 }
  0x43   :  { %862 = vmatprep.subr.bf16.mxu1 %v1076_v10  ;;  %938 = vmatprep.mubr.msk.bf16.mxu0 %vm987_vm0, %v986_v0 }
  0x44   :  { %923 = vmatpush3.bf16.msra.mxu0 %v978_v31 }
  0x45   :  { %924 = vmatprep.subr.bf16.mxu0 %v986_v0 }
  0x46   :  { %863 = vmatpush3.bf16.msra.mxu1 %v1085_v11 }
  0x47   :  { %864 = vmatprep.subr.bf16.mxu1 %v1091_v12 }
  0x48   :  { %925 = vmatpush3.bf16.msra.mxu0 %v979_v32 }
  0x49   :  { %926 = vmatprep.subr.bf16.mxu0 %v986_v0 }
  0x4a   :  { %865 = vmatpush3.bf16.msra.mxu1 %v1099_v13 }
  0x4b   :  { %866 = vmatprep.subr.bf16.mxu1 %v1105_v14 }
  0x4c   :  { %927 = vmatpush3.bf16.msra.mxu0 %v980_v33 }
  0x4d   :  { %928 = vmatprep.subr.bf16.mxu0 %v986_v0 }
  0x4e   :  { %867 = vmatpush3.bf16.msra.mxu1 %v1111_v15 }
  0x4f   :  { %868 = vmatprep.subr.bf16.mxu1 %v1122_v17 }
  0x50   :  { %929 = vmatpush3.bf16.msra.mxu0 %v981_v34 }
  0x51   :  { %930 = vmatprep.subr.bf16.mxu0 %v986_v0 }
  0x52   :  { %869 = vmatpush3.bf16.msra.mxu1 %v1133_v19 }
  0x53   :  { %870 = vmatprep.subr.bf16.mxu1 %v1139_v20 }
  0x54   :  { %931 = vmatpush3.bf16.msra.mxu0 %v982_v35 }
  0x55   :  { %932 = vmatprep.subr.bf16.mxu0 %v986_v0 }
  0x56   :  { %871 = vmatpush3.bf16.msra.mxu1 %v1147_v21 }
  0x57   :  { %914 = vmatprep.subr.bf16.mxu1 %v986_v0 }
  0x58   :  { %933 = vmatpush3.bf16.msra.mxu0 %v983_v36 }
  0x59   :  { %551 = vmatmul.mubr.bf16.vlgmr.msra.gmra.mxu1 %v974_v29  ;;  %934 = vmatprep.subr.bf16.mxu0 %v986_v0 }
  0x5a   :  { %915 = vmatpush3.bf16.msra.mxu1 %v1029_v2  ;;  %918 = vmatprep.mubr.msk.bf16.mxu1 %vm987_vm0, %v986_v0 }
  0x5b   :  { %916 = vmatprep.subr.bf16.mxu1 %v986_v0 }
  0x5c   :  { %935 = vmatpush3.bf16.msra.mxu0 %v984_v37 }
  0x5d   :  { %936 = vmatprep.subr.bf16.mxu0 %v986_v0 }
  0x5e   :  { %917 = vmatpush3.bf16.msra.mxu1 %v1048_v5  ;;  %v725_v5 = vld [vmem:[%s1285_s2] ss:$0 sm:$0xff] }
  0x60   :  { %937 = vmatpush3.bf16.msra.mxu0 %v985_v38 }
  0x61   :  { %919 = vmatmul.mubr.msk.bf16.vlgmr.msra.gmra.mxu1 %vm191_vm1, %v977_v30 }
  0xc9   :  { %v270_v39 = vpop.f32.mrf.mxu1 }
  0xcb   :  { %v896_v40 = vpop.f32.mrf.mxu1 }
  0xcd   :  { %v273_v41 = vpop.f32.mrf.mxu1 }
  0xcf   :  { %v897_v42 = vpop.f32.mrf.mxu1 }
  0xe2   :  { %v797_v54 = vpop.f32.mrf.mxu0 }
  0xe4   :  { %v798_v56 = vpop.f32.mrf.mxu0 }
  0xe5   :  { %v799_v1 = vadd.f32 %v798_v56, %v797_v54 }
  0xe6   :  { %v800_v57 = vpop.f32.mrf.mxu0 }
  0xe7   :  { %v230_v11 = vadd.f32 %v799_v1, %v725_v5 }
  0xe8   :  { %v801_v58 = vpop.f32.mrf.mxu0 }
  0xe9   :  { %v822_v43 = vpop.f32.mrf.mxu1  ;;  %v802_v2 = vadd.f32 %v801_v58, %v800_v57  ;;  %v271_v24 = vadd.f32 %v270_v39, %v230_v11 }
  0xeb   :  { %v823_v44 = vpop.f32.mrf.mxu1  ;;  %v233_v12 = vadd.f32 %v802_v2, %v725_v5  ;;  %v277_v35 = vmax.f32 %v271_v24, 0.0 }
  0xec   :  { %v824_v3 = vadd.f32 %v823_v44, %v822_v43 }
  0xed   :  { %v825_v45 = vpop.f32.mrf.mxu1  ;;  %v274_v26 = vadd.f32 %v273_v41, %v233_v12 }
  0xee   :  { %v337_v13 = vadd.f32 %v824_v3, %v725_v5 }
  0xef   :  { %v826_v46 = vpop.f32.mrf.mxu1  ;;  %v278_v37 = vmax.f32 %v274_v26, 0.0 }
  0xf0   :  { %v827_v6 = vadd.f32 %v826_v46, %v825_v45 }
  0xf1   :  { %v377_v47 = vpop.f32.mrf.mxu1 }
  0xf2   :  { %v340_v15 = vadd.f32 %v827_v6, %v725_v5  ;;  %v378_v20 = vadd.f32 %v377_v47, %v337_v13  ;;  %v772_v47 = vld [vmem:[%s1286_s4] ss:$0 sm:$0xff] }
  0xf3   :  { %v904_v48 = vpop.f32.mrf.mxu1 }
  0xf4   :  { %v384_v31 = vmax.f32 %v378_v20, 0.0 }
  0xf5   :  { %v380_v49 = vpop.f32.mrf.mxu1 }
  0xf6   :  { %v381_v21 = vadd.f32 %v380_v49, %v340_v15  ;;  %v386_v43 = vmax.f32 %v277_v35, %v384_v31 }
  0xf7   :  { %v905_v50 = vpop.f32.mrf.mxu1 }
  0xf8   :  { %v385_v32 = vmax.f32 %v381_v21, 0.0 }
  0xf9   :  { %v486_v51 = vpop.f32.mrf.mxu1 }
  0xfa   :  { %v387_v44 = vmax.f32 %v278_v37, %v385_v32 }
  0xfb   :  { %v912_v52 = vpop.f32.mrf.mxu1 }
  0xfd   :  { %v489_v53 = vpop.f32.mrf.mxu1 }
  0xff   :  { %v913_v55 = vpop.f32.mrf.mxu1 }
 0x102   :  { %v847_v59 = vpop.f32.mrf.mxu0 }
 0x104   :  { %v848_v60 = vpop.f32.mrf.mxu0 }
 0x105   :  { %v849_v0 = vadd.f32 %v848_v60, %v847_v59 }
 0x106   :  { %v850_v61 = vpop.f32.mrf.mxu0 }
 0x107   :  { %v446_v10 = vadd.f32 %v849_v0, %v725_v5 }
 0x108   :  { %v851_v62 = vpop.f32.mrf.mxu0 }
 0x109   :  { %v852_v7 = vadd.f32 %v851_v62, %v850_v61  ;;  %v487_v22 = vadd.f32 %v486_v51, %v446_v10 }
 0x10b   :  { %v449_v16 = vadd.f32 %v852_v7, %v725_v5  ;;  %v493_v33 = vmax.f32 %v487_v22, 0.0 }
 0x10d   :  { %v490_v27 = vadd.f32 %v489_v53, %v449_v16 }
 0x10f   :  { %v494_v40 = vmax.f32 %v490_v27, 0.0 }
 0x119   :  { %v872_v63 = vpop.f32.mrf.mxu1 }
 0x11b   :  { %v873_v4 = vpop.f32.mrf.mxu1 }
 0x11c   :  { %v874_v8 = vadd.f32 %v873_v4, %v872_v63 }
 0x11d   :  { %v875_v9 = vpop.f32.mrf.mxu1 }
 0x11e   :  { %v553_v18 = vadd.f32 %v874_v8, %v725_v5 }
 0x11f   :  { %v876_v14 = vpop.f32.mrf.mxu1 }
 0x120   :  { %v877_v17 = vadd.f32 %v876_v14, %v875_v9 }
 0x121   :  { %v593_v19 = vpop.f32.mrf.mxu1 }
 0x122   :  { %v594_v23 = vadd.f32 %v593_v19, %v553_v18  ;;  %v556_v29 = vadd.f32 %v877_v17, %v725_v5 }
 0x123   :  { %v920_v25 = vpop.f32.mrf.mxu1 }
 0x124   :  { %v600_v28 = vmax.f32 %v594_v23, 0.0 }
 0x125   :  { %v596_v30 = vpop.f32.mrf.mxu1 }
 0x126   :  { %v597_v34 = vadd.f32 %v596_v30, %v556_v29  ;;  %v602_v38 = vmax.f32 %v493_v33, %v600_v28 }
 0x127   :  { %v921_v36 = vpop.f32.mrf.mxu1 }
 0x128   :  { %v601_v42 = vmax.f32 %v597_v34, 0.0  ;;  %v604_v39 = vmax.f32 %v386_v43, %v602_v38 }
 0x12a   :  { %v603_v45 = vmax.f32 %v494_v40, %v601_v42 }
 0x12c   :  { %v605_v46 = vmax.f32 %v387_v44, %v603_v45 }
 0x12e   :  { %v606_v41 = vpack.c.bf16 %v605_v46, %v604_v39 }
 0x130   :  { %939 = vmatmul.mubr.bf16.vlgmr.msra.gmra.mxu0 %v606_v41 }
 0x1f0   :  { %v712_v48 = vpop.f32.mrf.mxu0 }
 0x1f1   :  { %v713_v49 = vadd.f32 %v772_v47, %v712_v48 }
 0x1f2   :  { %v940_v50 = vpop.f32.mrf.mxu0 }
 0x1f3   :  { %719 = vst [vmem:[%s1287_s5] sm:$0xff] %v713_v49 }
 0x1f4   :  { %v715_v51 = vpop.f32.mrf.mxu0 }
 0x1f5   :  { %v716_v52 = vadd.f32 %v772_v47, %v715_v51 }
 0x1f6   :  { %v941_v53 = vpop.f32.mrf.mxu0 }
 0x1f7   :  { %720 = vst [vmem:[%s1287_s5 + $0x8] sm:$0xff] %v716_v52 }

</bundles_post_ra>
